<compile_context>
chip_gen: v7x
topology: tpu7x:2x2x1
jax: 0.10.0
libtpu: 0.0.40
codegen_flags: <defaults>
</compile_context>

<pallas_src>
import jax
import jax.numpy as jnp
import numpy as np
from jax.experimental import pallas as pl
from jax.experimental.pallas import tpu as pltpu

# ---------------- model hyper-params (small, consistent with the module) ----
FILTER_SIZES = (3, 4, 5)
NUM_FILTERS = 128          # num_filters in the PyTorch module
VOCAB_SIZE = 64
EMBED_DIM = 32
SEQ_LEN = 16
BATCH = 8
TOTAL_TAPS = sum(FILTER_SIZES)   # 12
DROPOUT_RATE = 0.5               # inference mode -> identity


def _textcnn_kernel(ids_ref, emb_ref, wpack_ref, bpack_ref, fcw_ref, fcb_ref,
                    o_ref):
    """Embedding gather + Conv1d(x3) + max-over-time + FC + sigmoid, fused."""
    BL = ids_ref.shape[0]                       # B * L
    V, E = emb_ref.shape
    F = bpack_ref.shape[1]
    B = o_ref.shape[0]
    L = BL // B

    # ---- embedding gather on the MXU: one_hot(ids) @ table ------------------
    ids = ids_ref[...]                                          # (B*L, 1) int32
    iota = jax.lax.broadcasted_iota(jnp.int32, (BL, V), 1)
    one_hot = (iota == ids).astype(jnp.float32)                 # (B*L, V)
    x = jnp.dot(one_hot, emb_ref[...],
                preferred_element_type=jnp.float32)             # (B*L, E)

    # ---- ONE packed matmul for all taps of all filters ----------------------
    y = jnp.dot(x, wpack_ref[...],
                preferred_element_type=jnp.float32)             # (B*L, 12F)
    y = y.reshape(B, L, TOTAL_TAPS * F)                         # leading split

    bias = bpack_ref[...]                                       # (3, F)
    fcw = fcw_ref[...]                                          # (3, F)

    # ---- per-filter time-shifted adds + max-pool + FC contribution ----------
    contrib = None
    chunk = 0
    for fi, f in enumerate(FILTER_SIZES):
        L_out = L - f + 1
        c0 = chunk * F
        acc = y[:, 0:L_out, c0:c0 + F]                          # tau = 0
        for tau in range(1, f):
            c = (chunk + tau) * F
            acc = acc + y[:, tau:tau + L_out, c:c + F]
        pooled = jnp.max(acc, axis=1) + bias[fi:fi + 1, :]      # (B, F)
        term = pooled * fcw[fi:fi + 1, :]                       # (B, F)
        contrib = term if contrib is None else contrib + term
        chunk += f

    logits = jnp.sum(contrib, axis=-1, keepdims=True) + fcb_ref[0]   # (B, 1)
    o_ref[...] = jax.nn.sigmoid(logits)


def textcnn_forward(input_ids, kparams):
    """input_ids: (B, L) int32.  Returns (B, 1) float32 probabilities."""
    B, L = input_ids.shape
    ids2 = input_ids.reshape(B * L, 1).astype(jnp.int32)   # lane->sublane done by XLA
    vmem = pl.BlockSpec(memory_space=pltpu.MemorySpace.VMEM)
    smem = pl.BlockSpec(memory_space=pltpu.MemorySpace.SMEM)
    # TODO(synk): when B/L are scaled to production sizes, add a batch grid
    # axis with dimension_semantics=("parallel",) so v7x's two TensorCores
    # share the work, and re-budget tiles against v7x's 64 MiB VMEM.
    return pl.pallas_call(
        _textcnn_kernel,
        out_shape=jax.ShapeDtypeStruct((B, 1), jnp.float32),
        in_specs=[vmem, vmem, vmem, vmem, vmem, smem],
        out_specs=vmem,
    )(ids2,
      kparams["embedding"],
      kparams["w_packed"],
      kparams["b_packed"],
      kparams["fc_w_packed"],
      kparams["fc_b"])


# ---------------- parameter setup (PyTorch-shaped) + packing -----------------
def init_params(key):
    ks = jax.random.split(key, 9)
    p = {}
    p["embedding"] = jax.random.normal(ks[0], (VOCAB_SIZE, EMBED_DIM),
                                       jnp.float32) * 0.1
    for i, f in enumerate(FILTER_SIZES):
        fan_in = EMBED_DIM * f
        # Conv1d weight layout matches torch: (out_channels, in_channels, f)
        p[f"conv_w{f}"] = (jax.random.normal(ks[1 + 2 * i],
                                             (NUM_FILTERS, EMBED_DIM, f),
                                             jnp.float32) / np.sqrt(fan_in))
        p[f"conv_b{f}"] = jax.random.normal(ks[2 + 2 * i], (NUM_FILTERS,),
                                            jnp.float32) * 0.01
    # Linear weight layout matches torch: (out_features, in_features)
    p["fc_w"] = (jax.random.normal(ks[7], (1, NUM_FILTERS * len(FILTER_SIZES)),
                                   jnp.float32)
                 / np.sqrt(NUM_FILTERS * len(FILTER_SIZES)))
    p["fc_b"] = jax.random.normal(ks[8], (1,), jnp.float32) * 0.01
    return p


def pack_params(p):
    """Pack the 9 torch-shaped params into 4 dense VMEM arrays + 1 SMEM scalar."""
    F = NUM_FILTERS
    cols, biases, fcw_chunks = [], [], []
    for i, f in enumerate(FILTER_SIZES):
        w = p[f"conv_w{f}"]                       # (F, E, f)
        for tau in range(f):
            cols.append(w[:, :, tau].T)           # (E, F) per tap
        biases.append(p[f"conv_b{f}"])            # (F,)
        fcw_chunks.append(p["fc_w"][0, i * F:(i + 1) * F])
    return {
        "embedding": p["embedding"],                       # (V, E)
        "w_packed": jnp.concatenate(cols, axis=1),         # (E, 12F)
        "b_packed": jnp.stack(biases, axis=0),             # (3, F)
        "fc_w_packed": jnp.stack(fcw_chunks, axis=0),      # (3, F)
        "fc_b": p["fc_b"],                                 # (1,)
    }


# ---------------- plain-JAX reference mirroring the PyTorch forward ----------
def _reference_forward(input_ids, p):
    x = jnp.take(p["embedding"], input_ids, axis=0)        # (B, L, E)
    pooled = []
    for f in FILTER_SIZES:
        w, b = p[f"conv_w{f}"], p[f"conv_b{f}"]
        L_out = x.shape[1] - f + 1
        acc = None
        for tau in range(f):
            t = jnp.einsum("ble,fe->blf", x[:, tau:tau + L_out, :], w[:, :, tau])
            acc = t if acc is None else acc + t
        pooled.append(jnp.max(acc + b[None, None, :], axis=1))
    feat = jnp.concatenate(pooled, axis=-1)                # (B, 3F)
    logits = feat @ p["fc_w"].T + p["fc_b"]                # dropout(eval)=id
    return jax.nn.sigmoid(logits)


if __name__ == "__main__":
    key = jax.random.PRNGKey(0)
    k_param, k_ids = jax.random.split(key)
    params = init_params(k_param)
    kparams = pack_params(params)
    input_ids = jax.random.randint(k_ids, (BATCH, SEQ_LEN), 0, VOCAB_SIZE,
                                   dtype=jnp.int32)

    out = jax.block_until_ready(textcnn_forward(input_ids, kparams))
    ref = jax.block_until_ready(_reference_forward(input_ids, params))

    assert out.shape == (BATCH, 1), out.shape
    np.testing.assert_allclose(np.asarray(out), np.asarray(ref),
                               rtol=1e-5, atol=1e-5)
    print("KERNEL_OK")
</pallas_src>

<mosaic_0001>
module attributes {stable_mosaic.version = 11 : i64} {
  func.func @_textcnn_kernel(%arg0: memref<128x1xi32, #tpu.memory_space<vmem>>, %arg1: memref<64x32xf32, #tpu.memory_space<vmem>>, %arg2: memref<32x1536xf32, #tpu.memory_space<vmem>>, %arg3: memref<3x128xf32, #tpu.memory_space<vmem>>, %arg4: memref<3x128xf32, #tpu.memory_space<vmem>>, %arg5: memref<1xf32, #tpu.memory_space<smem>>, %arg6: memref<8x1xf32, #tpu.memory_space<vmem>>) attributes {dimension_semantics = [], scalar_prefetch = 0 : i64, scratch_operands = 0 : i64, tpu.core_type = #tpu.core_type<tc>} {
    %c0 = arith.constant 0 : index
    %c0_0 = arith.constant 0 : index
    %0 = vector.load %arg0[%c0, %c0_0] : memref<128x1xi32, #tpu.memory_space<vmem>>, vector<128x1xi32>
    %1 = tpu.iota {dimensions = array<i32: 1>} : vector<128x64xi32>
    %2 = vector.broadcast %0 : vector<128x1xi32> to vector<128x64xi32>
    %3 = arith.cmpi eq, %1, %2 : vector<128x64xi32>
    %4 = arith.extui %3 : vector<128x64xi1> to vector<128x64xi32>
    %5 = arith.sitofp %4 : vector<128x64xi32> to vector<128x64xf32>
    %c0_1 = arith.constant 0 : index
    %c0_2 = arith.constant 0 : index
    %6 = vector.load %arg1[%c0_1, %c0_2] : memref<64x32xf32, #tpu.memory_space<vmem>>, vector<64x32xf32>
    %cst = arith.constant dense<0.000000e+00> : vector<128x32xf32>
    %7 = tpu.matmul %5, %6, %cst {dimension_numbers = #tpu.dot_dimension_numbers<[1], [0], [0], [1], [0, 0, 1, 1], [], []>} : vector<128x64xf32>, vector<64x32xf32>, vector<128x32xf32> -> vector<128x32xf32>
    %c0_3 = arith.constant 0 : index
    %c0_4 = arith.constant 0 : index
    %8 = vector.load %arg2[%c0_3, %c0_4] : memref<32x1536xf32, #tpu.memory_space<vmem>>, vector<32x1536xf32>
    %cst_5 = arith.constant dense<0.000000e+00> : vector<128x1536xf32>
    %9 = tpu.matmul %7, %8, %cst_5 {dimension_numbers = #tpu.dot_dimension_numbers<[1], [0], [0], [1], [0, 0, 1, 1], [], []>} : vector<128x32xf32>, vector<32x1536xf32>, vector<128x1536xf32> -> vector<128x1536xf32>
    %10 = vector.shape_cast %9 : vector<128x1536xf32> to vector<8x16x1536xf32>
    %c0_6 = arith.constant 0 : index
    %c0_7 = arith.constant 0 : index
    %11 = vector.load %arg3[%c0_6, %c0_7] : memref<3x128xf32, #tpu.memory_space<vmem>>, vector<3x128xf32>
    %c0_8 = arith.constant 0 : index
    %c0_9 = arith.constant 0 : index
    %12 = vector.load %arg4[%c0_8, %c0_9] : memref<3x128xf32, #tpu.memory_space<vmem>>, vector<3x128xf32>
    %13 = vector.extract_strided_slice %10 {offsets = [0, 0, 0], sizes = [8, 14, 128], strides = [1, 1, 1]} : vector<8x16x1536xf32> to vector<8x14x128xf32>
    %14 = vector.extract_strided_slice %10 {offsets = [0, 1, 128], sizes = [8, 14, 128], strides = [1, 1, 1]} : vector<8x16x1536xf32> to vector<8x14x128xf32>
    %15 = arith.addf %13, %14 : vector<8x14x128xf32>
    %16 = vector.extract_strided_slice %10 {offsets = [0, 2, 256], sizes = [8, 14, 128], strides = [1, 1, 1]} : vector<8x16x1536xf32> to vector<8x14x128xf32>
    %17 = arith.addf %15, %16 : vector<8x14x128xf32>
    %cst_10 = arith.constant dense<0xFF800000> : vector<8x128xf32>
    %18 = vector.multi_reduction <maximumf>, %17, %cst_10 [1] : vector<8x14x128xf32> to vector<8x128xf32>
    %19 = vector.extract_strided_slice %11 {offsets = [0, 0], sizes = [1, 128], strides = [1, 1]} : vector<3x128xf32> to vector<1x128xf32>
    %20 = vector.broadcast %19 : vector<1x128xf32> to vector<8x128xf32>
    %21 = arith.addf %18, %20 : vector<8x128xf32>
    %22 = vector.extract_strided_slice %12 {offsets = [0, 0], sizes = [1, 128], strides = [1, 1]} : vector<3x128xf32> to vector<1x128xf32>
    %23 = vector.broadcast %22 : vector<1x128xf32> to vector<8x128xf32>
    %24 = arith.mulf %21, %23 : vector<8x128xf32>
    %25 = vector.extract_strided_slice %10 {offsets = [0, 0, 384], sizes = [8, 13, 128], strides = [1, 1, 1]} : vector<8x16x1536xf32> to vector<8x13x128xf32>
    %26 = vector.extract_strided_slice %10 {offsets = [0, 1, 512], sizes = [8, 13, 128], strides = [1, 1, 1]} : vector<8x16x1536xf32> to vector<8x13x128xf32>
    %27 = arith.addf %25, %26 : vector<8x13x128xf32>
    %28 = vector.extract_strided_slice %10 {offsets = [0, 2, 640], sizes = [8, 13, 128], strides = [1, 1, 1]} : vector<8x16x1536xf32> to vector<8x13x128xf32>
    %29 = arith.addf %27, %28 : vector<8x13x128xf32>
    %30 = vector.extract_strided_slice %10 {offsets = [0, 3, 768], sizes = [8, 13, 128], strides = [1, 1, 1]} : vector<8x16x1536xf32> to vector<8x13x128xf32>
    %31 = arith.addf %29, %30 : vector<8x13x128xf32>
    %cst_11 = arith.constant dense<0xFF800000> : vector<8x128xf32>
    %32 = vector.multi_reduction <maximumf>, %31, %cst_11 [1] : vector<8x13x128xf32> to vector<8x128xf32>
    %33 = vector.extract_strided_slice %11 {offsets = [1, 0], sizes = [1, 128], strides = [1, 1]} : vector<3x128xf32> to vector<1x128xf32>
    %34 = vector.broadcast %33 : vector<1x128xf32> to vector<8x128xf32>
    %35 = arith.addf %32, %34 : vector<8x128xf32>
    %36 = vector.extract_strided_slice %12 {offsets = [1, 0], sizes = [1, 128], strides = [1, 1]} : vector<3x128xf32> to vector<1x128xf32>
    %37 = vector.broadcast %36 : vector<1x128xf32> to vector<8x128xf32>
    %38 = arith.mulf %35, %37 : vector<8x128xf32>
    %39 = arith.addf %24, %38 : vector<8x128xf32>
    %40 = vector.extract_strided_slice %10 {offsets = [0, 0, 896], sizes = [8, 12, 128], strides = [1, 1, 1]} : vector<8x16x1536xf32> to vector<8x12x128xf32>
    %41 = vector.extract_strided_slice %10 {offsets = [0, 1, 1024], sizes = [8, 12, 128], strides = [1, 1, 1]} : vector<8x16x1536xf32> to vector<8x12x128xf32>
    %42 = arith.addf %40, %41 : vector<8x12x128xf32>
    %43 = vector.extract_strided_slice %10 {offsets = [0, 2, 1152], sizes = [8, 12, 128], strides = [1, 1, 1]} : vector<8x16x1536xf32> to vector<8x12x128xf32>
    %44 = arith.addf %42, %43 : vector<8x12x128xf32>
    %45 = vector.extract_strided_slice %10 {offsets = [0, 3, 1280], sizes = [8, 12, 128], strides = [1, 1, 1]} : vector<8x16x1536xf32> to vector<8x12x128xf32>
    %46 = arith.addf %44, %45 : vector<8x12x128xf32>
    %47 = vector.extract_strided_slice %10 {offsets = [0, 4, 1408], sizes = [8, 12, 128], strides = [1, 1, 1]} : vector<8x16x1536xf32> to vector<8x12x128xf32>
    %48 = arith.addf %46, %47 : vector<8x12x128xf32>
    %cst_12 = arith.constant dense<0xFF800000> : vector<8x128xf32>
    %49 = vector.multi_reduction <maximumf>, %48, %cst_12 [1] : vector<8x12x128xf32> to vector<8x128xf32>
    %50 = vector.extract_strided_slice %11 {offsets = [2, 0], sizes = [1, 128], strides = [1, 1]} : vector<3x128xf32> to vector<1x128xf32>
    %51 = vector.broadcast %50 : vector<1x128xf32> to vector<8x128xf32>
    %52 = arith.addf %49, %51 : vector<8x128xf32>
    %53 = vector.extract_strided_slice %12 {offsets = [2, 0], sizes = [1, 128], strides = [1, 1]} : vector<3x128xf32> to vector<1x128xf32>
    %54 = vector.broadcast %53 : vector<1x128xf32> to vector<8x128xf32>
    %55 = arith.mulf %52, %54 : vector<8x128xf32>
    %56 = arith.addf %39, %55 : vector<8x128xf32>
    %cst_13 = arith.constant dense<0.000000e+00> : vector<8xf32>
    %57 = vector.multi_reduction <add>, %56, %cst_13 [1] : vector<8x128xf32> to vector<8xf32>
    %58 = vector.shape_cast %57 : vector<8xf32> to vector<8x1xf32>
    %c0_14 = arith.constant 0 : index
    %59 = memref.load %arg5[%c0_14] : memref<1xf32, #tpu.memory_space<smem>>
    %60 = vector.broadcast %59 : f32 to vector<8x1xf32>
    %61 = arith.addf %58, %60 : vector<8x1xf32>
    %62 = arith.negf %61 : vector<8x1xf32>
    %63 = math.exp %62 : vector<8x1xf32>
    %cst_15 = arith.constant 1.000000e+00 : f32
    %64 = vector.broadcast %cst_15 : f32 to vector<8x1xf32>
    %65 = arith.addf %64, %63 : vector<8x1xf32>
    %66 = arith.divf %64, %65 : vector<8x1xf32>
    %c0_16 = arith.constant 0 : index
    %c0_17 = arith.constant 0 : index
    %67 = vector.load %arg6[%c0_16, %c0_17] : memref<8x1xf32, #tpu.memory_space<vmem>>, vector<8x1xf32>
    tpu.vector_store %arg6[%c0_16, %c0_17], %66 {strides = array<i32>} : memref<8x1xf32, #tpu.memory_space<vmem>>, vector<8x1xf32>,
    return
  }
}

</mosaic_0001>

<bundles_post_ra>
// kernel: tpu_custom_call.1
= control target key start
LH: loop header
LB: loop body
LE: loop exit
PB: predicated region body
PF: predicated region fallthrough
CT: control target
= control target key end

     0   :  { %12 = vsyncpa [#allocation4], 0  ;;  %s2695_s21 = smov [#allocation3]   ;;  %s3820_s0 = inlined_call_operand.vmem [shape: s32[128,1], index: 0, kind: input, shape index: {}]   ;;  %s3821_s1 = inlined_call_operand.vmem [shape: f32[64,32], index: 1, kind: input, shape index: {}]   ;;  %s3822_s2 = inlined_call_operand.hbm [shape: f32[32,1536], index: 2, kind: input, shape index: {}]   ;;  %s3823_s3 = inlined_call_operand.vmem [shape: f32[3,128], index: 3, kind: input, shape index: {}]   ;;  %s3824_s4 = inlined_call_operand.vmem [shape: f32[3,128], index: 4, kind: input, shape index: {}]   ;;  %s3825_s5 = inlined_call_operand.<no memory space> [shape: f32[1], index: 5, kind: input, shape index: {}]   ;;  %s3826_s6 = inlined_call_operand.vmem [shape: f32[8,1], index: 6, kind: output, shape index: {}]  }
   0x1   :  { %s22_s22 = sshll.u32 %s2695_s21, 4  ;;  %s2671_s25 = scalar_lea.hbm %s3822_s2, 6144  ;;  %s23_s22 = int_to_ptr.vmem [resolvable:$true] %s22_s22 }
   0x2   :  { %p2672_p0 = scmp.ne.s32.totalorder %s3822_s2, %s2671_s25  ;;  %p2675_p1 = scmp.lt.u32.totalorder %s2671_s25, %s3822_s2 }
   0x4   :  { %p2677_p2 = pnand %p2675_p1, %p2672_p0 }
   0x6   :  { %2680 = shalt.err (!%p2677_p2)
}
   0x7   :  { %s2681_s30 = scalar_lea.vmem %s23_s22, 6144  ;;  %p2686_p4 = scmp.lt.s32.totalorder %s23_s22, %s23_s22 }
   0x8   :  { %p2682_p3 = scmp.ne.s32.totalorder %s23_s22, %s2681_s30  ;;  %p2687_p5 = scmp.lt.s32.totalorder %s2681_s30, %s2681_s30 }
   0xa   :  { %p2688_p6 = por %p2687_p5, %p2686_p4 }
   0xc   :  { %p2689_p7 = pnand %p2688_p6, %p2682_p3 }
   0xe   :  { %2692 = shalt.err (!%p2689_p7)
}
   0xf   :  { %s2696_s7 = smov 1536   ;;  %s2697_s8 = smov 96  }
  0x10   :  { %28 = dma.hbm_to_vmem [thread:$0]  %s3822_s2, 6144, %s23_s22, [#allocation4], %s2696_s7, %s2696_s7, %s2697_s8  }
  0x11   :  { %2693 = dma.done.wait [#allocation4], 6144  }
  0x12   :  { %2694 = vsyncadd [#allocation4], 4294961152  ;;  %v2698_v0 = vmov 0   ;;  %v2699_v1 = vmov 0.0   ;;  %v40_v2 = vld [vmem:[%s3820_s0 + $0x10] sm:$0xff]  ;;  %v38_v3 = vld [vmem:[%s3820_s0] sm:$0xff]  ;;  %v54_v45 = vlaneseq }
  0x13   :  { %2666 = vset.pattern.permute.xlu1 %v2698_v0  ;;  %2665 = vset.pattern.permute.xlu0 %v2698_v0  ;;  %v41_v4 = vld [vmem:[%s3820_s0 + $0x18] sm:$0xff]  ;;  %v39_v5 = vld [vmem:[%s3820_s0 + $0x8] sm:$0xff]  ;;  %v152_v7 = vld [vmem:[%s3821_s1] sm:$0xff]  ;;  %vm160_vm0 = vcmask 523264  }
  0x14   :  { %515 = vmatprep.mubr.f32.mxu1 %v2699_v1  ;;  %63 = vperm.xlu1 %2666, %v40_v2   ;;  %v43_v6 = vld [vmem:[%s3820_s0 + $0x28] sm:$0xff]  ;;  %v42_v9 = vld [vmem:[%s3820_s0 + $0x20] sm:$0xff]  ;;  %v154_v11 = vld [vmem:[%s3821_s1 + $0x10] sm:$0xff]  ;;  %v2821_v46 = vand.u32 127, %v54_v45 }
  0x15   :  { %57 = vperm.xlu0 %2665, %v38_v3   ;;  %v153_v8 = vld [vmem:[%s3821_s1 + $0x8] sm:$0xff]  ;;  %v155_v12 = vld [vmem:[%s3821_s1 + $0x18] sm:$0xff]  ;;  %v156_v14 = vld [vmem:[%s3821_s1 + $0x20] sm:$0xff] }
  0x16   :  { %v2592_v10 = vpack.c.bf16 %v153_v8, %v152_v7  ;;  %v2596_v13 = vpack.c.bf16 %v155_v12, %v154_v11  ;;  %v157_v15 = vld [vmem:[%s3821_s1 + $0x28] sm:$0xff]  ;;  %v45_v16 = vld [vmem:[%s3820_s0 + $0x38] sm:$0xff]  ;;  %v44_v17 = vld [vmem:[%s3820_s0 + $0x30] sm:$0xff] }
  0x17   :  { %v2600_v18 = vpack.c.bf16 %v157_v15, %v156_v14  ;;  %v158_v19 = vld [vmem:[%s3821_s1 + $0x30] sm:$0xff]  ;;  %v159_v20 = vld [vmem:[%s3821_s1 + $0x38] sm:$0xff]  ;;  %v47_v21 = vld [vmem:[%s3820_s0 + $0x48] sm:$0xff] }
  0x18   :  { %66 = vperm.xlu1 %2666, %v41_v4   ;;  %2593 = vmatprep.subr.bf16.mxu0 %v2592_v10  ;;  %v46_v22 = vld [vmem:[%s3820_s0 + $0x40] sm:$0xff]  ;;  %v2604_v23 = vpack.c.bf16 %v159_v20, %v158_v19  ;;  %v49_v24 = vld [vmem:[%s3820_s0 + $0x58] sm:$0xff]  ;;  %v48_v25 = vld [vmem:[%s3820_s0 + $0x50] sm:$0xff] }
  0x19   :  { %60 = vperm.xlu0 %2665, %v39_v5   ;;  %2595 = vmatpush3.bf16.msra.mxu0 %v2592_v10  ;;  %v51_v26 = vld [vmem:[%s3820_s0 + $0x68] sm:$0xff]  ;;  %v50_v27 = vld [vmem:[%s3820_s0 + $0x60] sm:$0xff]  ;;  %v53_v28 = vld [vmem:[%s3820_s0 + $0x78] sm:$0xff] }
  0x1a   :  { %2597 = vmatprep.subr.bf16.mxu0 %v2596_v13  ;;  %v52_v29 = vld [vmem:[%s3820_s0 + $0x70] sm:$0xff]  ;;  %v355_v30 = vld [vmem:[#allocation3 + $0x8] sm:$0xff]  ;;  %v354_v32 = vld [vmem:[#allocation3] sm:$0xff] }
  0x1b   :  { %v367_v31 = vld [vmem:[#allocation3 + $0x68] sm:$0xff]  ;;  %v366_v34 = vld [vmem:[#allocation3 + $0x60] sm:$0xff]  ;;  %v357_v35 = vld [vmem:[#allocation3 + $0x18] sm:$0xff] }
  0x1c   :  { %72 = vperm.xlu1 %2666, %v43_v6   ;;  %v2608_v33 = vpack.c.bf16 %v367_v31, %v355_v30  ;;  %v369_v36 = vld [vmem:[#allocation3 + $0x78] sm:$0xff]  ;;  %v2610_v37 = vpack.c.bf16 %v366_v34, %v354_v32  ;;  %v379_v39 = vld [vmem:[#allocation3 + $0xc8] sm:$0xff]  ;;  %v378_v41 = vld [vmem:[#allocation3 + $0xc0] sm:$0xff] }
  0x1d   :  { %69 = vperm.xlu0 %2665, %v42_v9   ;;  %2599 = vmatpush3.bf16.msra.mxu0 %v2596_v13  ;;  %v2616_v38 = vpack.c.bf16 %v369_v36, %v357_v35  ;;  %v391_v40 = vld [vmem:[#allocation3 + $0x128] sm:$0xff]  ;;  %v390_v42 = vld [vmem:[#allocation3 + $0x120] sm:$0xff]  ;;  %v356_v49 = vld [vmem:[#allocation3 + $0x10] sm:$0xff] }
  0x1e   :  { %2601 = vmatprep.subr.bf16.mxu0 %v2600_v18  ;;  %2609 = vmatprep.subr.bf16.mxu1 %v2608_v33  ;;  %v2612_v43 = vpack.c.bf16 %v391_v40, %v379_v39  ;;  %v2614_v44 = vpack.c.bf16 %v390_v42, %v378_v41  ;;  %v368_v50 = vld [vmem:[#allocation3 + $0x70] sm:$0xff]  ;;  %v381_v52 = vld [vmem:[#allocation3 + $0xd8] sm:$0xff] }
  0x1f   :  { %2611 = vmatpush1.bf16.msra.mxu1 %v2610_v37  ;;  %v393_v53 = vld [vmem:[#allocation3 + $0x138] sm:$0xff]  ;;  %v2827_v56 = vpack.c.bf16 %v368_v50, %v356_v49  ;;  %v380_v59 = vld [vmem:[#allocation3 + $0xd0] sm:$0xff]  ;;  %v359_v37 = vld [vmem:[#allocation3 + $0x28] sm:$0xff] }
  0x20   :  { %78 = vperm.xlu1 %2666, %v45_v16   ;;  %2613 = vmatprep.subr.bf16.mxu1 %v2612_v43  ;;  %v2832_v58 = vpack.c.bf16 %v393_v53, %v381_v52  ;;  %v392_v60 = vld [vmem:[#allocation3 + $0x130] sm:$0xff]  ;;  %v385_v33 = vld [vmem:[#allocation3 + $0xf8] sm:$0xff] }
  0x21   :  { %75 = vperm.xlu0 %2665, %v44_v17   ;;  %2603 = vmatpush3.bf16.msra.mxu0 %v2600_v18  ;;  %v2839_v2 = vpack.c.bf16 %v392_v60, %v380_v59  ;;  %v397_v34 = vld [vmem:[#allocation3 + $0x158] sm:$0xff]  ;;  %v384_v35 = vld [vmem:[#allocation3 + $0xf0] sm:$0xff] }
  0x22   :  { %2605 = vmatprep.subr.bf16.mxu0 %v2604_v23  ;;  %v396_v36 = vld [vmem:[#allocation3 + $0x150] sm:$0xff]  ;;  %v2636_v40 = vpack.c.bf16 %v397_v34, %v385_v33 }
  0x23   :  { %2615 = vmatpush1.bf16.msra.mxu1 %v2614_v44  ;;  %v2638_v42 = vpack.c.bf16 %v396_v36, %v384_v35  ;;  %v365_v44 = vld [vmem:[#allocation3 + $0x58] sm:$0xff]  ;;  %v364_v60 = vld [vmem:[#allocation3 + $0x50] sm:$0xff] }
  0x24   :  { %84 = vperm.xlu1 %2666, %v47_v21   ;;  %2656 = vmatprep.subr.bf16.mxu1 %v2616_v38 }
  0x25   :  { %81 = vperm.xlu0 %2665, %v46_v22   ;;  %2607 = vmatpush3.bf16.msra.mxu0 %v2604_v23 }
  0x26   :  { %2617 = vmatprep.subr.bf16.mxu0 %v2616_v38  ;;  %v371_v38 = vld [vmem:[#allocation3 + $0x88] sm:$0xff] }
  0x27   :  { %v2624_v43 = vpack.c.bf16 %v371_v38, %v359_v37 }
  0x28   :  { %90 = vperm.xlu1 %2666, %v49_v24  }
  0x29   :  { %87 = vperm.xlu0 %2665, %v48_v25   ;;  %v361_v25 = vld [vmem:[#allocation3 + $0x38] sm:$0xff] }
  0x2c   :  { %96 = vperm.xlu1 %2666, %v51_v26   ;;  %v373_v26 = vld [vmem:[#allocation3 + $0x98] sm:$0xff] }
  0x2d   :  { %93 = vperm.xlu0 %2665, %v50_v27   ;;  %v2632_v27 = vpack.c.bf16 %v373_v26, %v361_v25  ;;  %v398_v25 = vld [vmem:[#allocation3 + $0x160] sm:$0xff] }
  0x30   :  { %102 = vperm.xlu1 %2666, %v53_v28   ;;  %v360_v28 = vld [vmem:[#allocation3 + $0x30] sm:$0xff] }
  0x31   :  { %99 = vperm.xlu0 %2665, %v52_v29   ;;  %v372_v29 = vld [vmem:[#allocation3 + $0x90] sm:$0xff] }
  0x32   :  { %v2634_v32 = vpack.c.bf16 %v372_v29, %v360_v28 }
  0x93   :  { %v64_v47 = vpop.permute.xlu1 %63 }
  0x94   :  { %v58_v48 = vpop.permute.xlu0 %57  ;;  %vm106_vm2 = vcmp.eq.s32.totalorder %v2821_v46, %v64_v47 }
  0x95   :  { %vm104_vm1 = vcmp.eq.s32.totalorder %v2821_v46, %v58_v48  ;;  %v2401_v57 = vsel %vm106_vm2, 1.0, %v2699_v1  ;;  %vm402_vm2 = vcmask 261120  }
  0x96   :  { %v2399_v51 = vsel %vm104_vm1, 1.0, %v2699_v1 }
  0x97   :  { %2568 = vmatprep.mubr.msk.f32.mxu0 %vm160_vm0, %v2399_v51  ;;  %v67_v54 = vpop.permute.xlu1 %66 }
  0x98   :  { %v61_v55 = vpop.permute.xlu0 %60  ;;  %vm107_vm3 = vcmp.eq.s32.totalorder %v2821_v46, %v67_v54 }
  0x99   :  { %vm105_vm4 = vcmp.eq.s32.totalorder %v2821_v46, %v61_v55  ;;  %v2402_v62 = vsel %vm107_vm3, 1.0, %v2699_v1  ;;  %vm1435_vm3 = vcmask 1046528  }
  0x9a   :  { %v2400_v61 = vsel %vm105_vm4, 1.0, %v2699_v1  ;;  %vm1813_vm4 = vcmask 1044480  }
  0x9b   :  { %2569 = vmatmul.mubr.msk.f32.vlgmr.msra.gmra.mrb[0].mxu0 %vm160_vm0, %v2400_v61  ;;  %v73_v63 = vpop.permute.xlu1 %72  ;;  %v376_v61 = vld [vmem:[#allocation3 + $0xb0] sm:$0xff] }
  0x9c   :  { %v70_v0 = vpop.permute.xlu0 %69  ;;  %2571 = vmatprep.mubr.msk.f32.mxu0 %vm160_vm0, %v2401_v57  ;;  %2619 = vmatpush1.bf16.msra.mxu0 %v2827_v56  ;;  %vm109_vm6 = vcmp.eq.s32.totalorder %v2821_v46, %v73_v63  ;;  %v401_v63 = vld [vmem:[#allocation3 + $0x178] sm:$0xff] }
  0x9d   :  { %vm108_vm5 = vcmp.eq.s32.totalorder %v2821_v46, %v70_v0  ;;  %2621 = vmatprep.subr.bf16.mxu0 %v2832_v58  ;;  %v2404_v6 = vsel %vm109_vm6, 1.0, %v2699_v1  ;;  %v2650_v0 = vpack.c.bf16 %v376_v61, %v364_v60  ;;  %vm2360_vm6 = vcmask 1041409  }
  0x9e   :  { %v2403_v3 = vsel %vm108_vm5, 1.0, %v2699_v1  ;;  %vm2198_vm5 = vcmask 1043456  }
  0x9f   :  { %2572 = vmatmul.mubr.msk.f32.gmra.mrb[2].mxu0 %vm160_vm0, %v2402_v62  ;;  %v79_v4 = vpop.permute.xlu1 %78  ;;  %v389_v62 = vld [vmem:[#allocation3 + $0x118] sm:$0xff] }
  0xa0   :  { %2574 = vmatprep.mubr.msk.f32.mxu0 %vm160_vm0, %v2403_v3  ;;  %v76_v5 = vpop.permute.xlu0 %75  ;;  %2623 = vmatpush1.bf16.msra.mxu0 %v2839_v2  ;;  %vm111_vm8 = vcmp.eq.s32.totalorder %v2821_v46, %v79_v4  ;;  %v388_v3 = vld [vmem:[#allocation3 + $0x110] sm:$0xff] }
  0xa1   :  { %vm110_vm7 = vcmp.eq.s32.totalorder %v2821_v46, %v76_v5  ;;  %v2406_v10 = vsel %vm111_vm8, 1.0, %v2699_v1  ;;  %2633 = vmatprep.subr.bf16.mxu0 %v2632_v27  ;;  %v400_v4 = vld [vmem:[#allocation3 + $0x170] sm:$0xff]  ;;  %vm2366_vm8 = vcmask 1043459  }
  0xa2   :  { %v2405_v7 = vsel %vm110_vm7, 1.0, %v2699_v1  ;;  %v2654_v5 = vpack.c.bf16 %v400_v4, %v388_v3  ;;  %vm2363_vm7 = vcmask 1042434  }
  0xa3   :  { %2575 = vmatmul.mubr.msk.f32.gmra.mrb[4].mxu0 %vm160_vm0, %v2404_v6  ;;  %v85_v8 = vpop.permute.xlu1 %84  ;;  %v358_v6 = vld [vmem:[#allocation3 + $0x20] sm:$0xff] }
  0xa4   :  { %2577 = vmatprep.mubr.msk.f32.mxu0 %vm160_vm0, %v2405_v7  ;;  %v82_v9 = vpop.permute.xlu0 %81  ;;  %vm113_vm10 = vcmp.eq.s32.totalorder %v2821_v46, %v85_v8  ;;  %v370_v7 = vld [vmem:[#allocation3 + $0x80] sm:$0xff]  ;;  %v383_v8 = vld [vmem:[#allocation3 + $0xe8] sm:$0xff] }
  0xa5   :  { %vm112_vm9 = vcmp.eq.s32.totalorder %v2821_v46, %v82_v9  ;;  %v2408_v14 = vsel %vm113_vm10, 1.0, %v2699_v1  ;;  %v395_v9 = vld [vmem:[#allocation3 + $0x148] sm:$0xff]  ;;  %vm2372_vm10 = vcmask 1045509  }
  0xa6   :  { %v2407_v11 = vsel %vm112_vm9, 1.0, %v2699_v1  ;;  %vm2369_vm9 = vcmask 1044484  }
  0xa7   :  { %2578 = vmatmul.mubr.msk.f32.gmra.mrb[6].mxu0 %vm160_vm0, %v2406_v10  ;;  %v91_v12 = vpop.permute.xlu1 %90  ;;  %v2626_v10 = vpack.c.bf16 %v370_v7, %v358_v6 }
  0xa8   :  { %2580 = vmatprep.mubr.msk.f32.mxu0 %vm160_vm0, %v2407_v11  ;;  %v88_v13 = vpop.permute.xlu0 %87  ;;  %vm115_vm12 = vcmp.eq.s32.totalorder %v2821_v46, %v91_v12  ;;  %v2628_v11 = vpack.c.bf16 %v395_v9, %v383_v8  ;;  %v382_v12 = vld [vmem:[#allocation3 + $0xe0] sm:$0xff] }
  0xa9   :  { %vm114_vm11 = vcmp.eq.s32.totalorder %v2821_v46, %v88_v13  ;;  %v2410_v18 = vsel %vm115_vm12, 1.0, %v2699_v1  ;;  %v394_v13 = vld [vmem:[#allocation3 + $0x140] sm:$0xff]  ;;  %vm2378_vm12 = vcmask 1047559  }
  0xaa   :  { %v2409_v15 = vsel %vm114_vm11, 1.0, %v2699_v1  ;;  %vm2375_vm11 = vcmask 1046534  }
  0xab   :  { %2581 = vmatmul.mubr.msk.f32.gmra.mrb[8].mxu0 %vm160_vm0, %v2408_v14  ;;  %v97_v16 = vpop.permute.xlu1 %96  ;;  %v363_v14 = vld [vmem:[#allocation3 + $0x48] sm:$0xff] }
  0xac   :  { %2583 = vmatprep.mubr.msk.f32.mxu0 %vm160_vm0, %v2409_v15  ;;  %v94_v17 = vpop.permute.xlu0 %93  ;;  %vm117_vm14 = vcmp.eq.s32.totalorder %v2821_v46, %v97_v16  ;;  %v375_v15 = vld [vmem:[#allocation3 + $0xa8] sm:$0xff]  ;;  %v2630_v16 = vpack.c.bf16 %v394_v13, %v382_v12 }
  0xad   :  { %vm116_vm13 = vcmp.eq.s32.totalorder %v2821_v46, %v94_v17  ;;  %v2412_v22 = vsel %vm117_vm14, 1.0, %v2699_v1  ;;  %v2640_v17 = vpack.c.bf16 %v375_v15, %v363_v14 }
  0xae   :  { %v2411_v19 = vsel %vm116_vm13, 1.0, %v2699_v1  ;;  %vm2392_vm13 = vcmask 7168  }
  0xaf   :  { %2584 = vmatmul.mubr.msk.f32.gmra.mrb[10].mxu0 %vm160_vm0, %v2410_v18  ;;  %v103_v20 = vpop.permute.xlu1 %102  ;;  %v362_v18 = vld [vmem:[#allocation3 + $0x40] sm:$0xff] }
  0xb0   :  { %2586 = vmatprep.mubr.msk.f32.mxu0 %vm160_vm0, %v2411_v19  ;;  %v100_v21 = vpop.permute.xlu0 %99  ;;  %vm119_vm1 = vcmp.eq.s32.totalorder %v2821_v46, %v103_v20  ;;  %v374_v19 = vld [vmem:[#allocation3 + $0xa0] sm:$0xff]  ;;  %v387_v20 = vld [vmem:[#allocation3 + $0x108] sm:$0xff] }
  0xb1   :  { %vm118_vm15 = vcmp.eq.s32.totalorder %v2821_v46, %v100_v21  ;;  %v2414_v24 = vsel %vm119_vm1, 1.0, %v2699_v1  ;;  %v377_v46 = vld [vmem:[#allocation3 + $0xb8] sm:$0xff]  ;;  %v399_v21 = vld [vmem:[#allocation3 + $0x168] sm:$0xff] }
  0xb2   :  { %v2413_v23 = vsel %vm118_vm15, 1.0, %v2699_v1  ;;  %v2648_v48 = vpack.c.bf16 %v377_v46, %v365_v44 }
  0xb3   :  { %2587 = vmatmul.mubr.msk.f32.gmra.mrb[12].mxu0 %vm160_vm0, %v2412_v22  ;;  %v2642_v22 = vpack.c.bf16 %v374_v19, %v362_v18 }
  0xb4   :  { %2589 = vmatprep.mubr.msk.f32.mxu0 %vm160_vm0, %v2413_v23  ;;  %v2644_v23 = vpack.c.bf16 %v399_v21, %v387_v20 }
  0xb7   :  { %2590 = vmatmul.mubr.msk.f32.gmra.mrb[14].mxu0 %vm160_vm0, %v2414_v24  ;;  %v386_v24 = vld [vmem:[#allocation3 + $0x100] sm:$0xff]  ;;  %vm1508_vm0 = vcmask 1045504  }
  0xb8   :  { %676 = vmatprep.mubr.f32.mxu0 %v2699_v1  ;;  %v2646_v26 = vpack.c.bf16 %v398_v25, %v386_v24 }
 0x16e   :  { %v2881_v30 = vpop.f32.mrb[0].mxu0 }
 0x16f   :  { %v2883_v31 = vpop.f32.mrb[1].mxu0 }
 0x170   :  { %2431 = vmatmul.mubr.msk.f32.vlgmr.msra.gmra.mrb[0].mxu1 %vm402_vm2, %v2883_v31  ;;  %2447 = vmatmul.mubr.msk.f32.vlgmr.msra.gmra.mrb[16].mxu0 %vm402_vm2, %v2883_v31 }
 0x171   :  { %2658 = vmatpush1.bf16.msra.mxu1 %v2827_v56  ;;  %521 = vmatprep.mubr.f32.mxu1 %v2699_v1 }
 0x172   :  { %v2891_v39 = vpop.f32.mrb[2].mxu0  ;;  %682 = vmatprep.mubr.f32.mxu0 %v2699_v1  ;;  %2657 = vmatprep.subr.bf16.mxu1 %v2832_v58 }
 0x173   :  { %v2895_v41 = vpop.f32.mrb[3].mxu0  ;;  %2635 = vmatpush1.bf16.msra.mxu0 %v2634_v32 }
 0x174   :  { %2432 = vmatmul.mubr.msk.f32.gmra.mrb[2].mxu1 %vm402_vm2, %v2881_v30  ;;  %2448 = vmatmul.mubr.msk.f32.gmra.mrb[18].mxu0 %vm402_vm2, %v2881_v30 }
 0x175   :  { %527 = vmatprep.mubr.f32.mxu1 %v2699_v1  ;;  %688 = vmatprep.mubr.f32.mxu0 %v2699_v1 }
 0x176   :  { %v2903_v47 = vpop.f32.mrb[4].mxu0  ;;  %2659 = vmatpush1.bf16.msra.mxu1 %v2839_v2  ;;  %2637 = vmatprep.subr.bf16.mxu0 %v2636_v40  ;;  %v2652_v2 = vpack.c.bf16 %v401_v63, %v389_v62 }
 0x177   :  { %v2906_v49 = vpop.f32.mrb[5].mxu0  ;;  %2639 = vmatpush1.bf16.msra.mxu0 %v2638_v42  ;;  %2625 = vmatprep.subr.bf16.mxu1 %v2624_v43 }
 0x178   :  { %2433 = vmatmul.mubr.msk.f32.gmra.mrb[4].mxu1 %vm402_vm2, %v2895_v41  ;;  %2449 = vmatmul.mubr.msk.f32.gmra.mrb[20].mxu0 %vm402_vm2, %v2895_v41 }
 0x179   :  { %533 = vmatprep.mubr.f32.mxu1 %v2699_v1  ;;  %694 = vmatprep.mubr.f32.mxu0 %v2699_v1 }
 0x17a   :  { %v2914_v50 = vpop.f32.mrb[6].mxu0  ;;  %2649 = vmatprep.subr.bf16.mxu0 %v2648_v48 }
 0x17b   :  { %v2916_v51 = vpop.f32.mrb[7].mxu0 }
 0x17c   :  { %2434 = vmatmul.mubr.msk.f32.gmra.mrb[6].mxu1 %vm402_vm2, %v2891_v39  ;;  %2450 = vmatmul.mubr.msk.f32.gmra.mrb[22].mxu0 %vm402_vm2, %v2891_v39 }
 0x17d   :  { %539 = vmatprep.mubr.f32.mxu1 %v2699_v1  ;;  %700 = vmatprep.mubr.f32.mxu0 %v2699_v1 }
 0x17e   :  { %v2924_v52 = vpop.f32.mrb[8].mxu0 }
 0x17f   :  { %v2926_v53 = vpop.f32.mrb[9].mxu0 }
 0x180   :  { %2435 = vmatmul.mubr.msk.f32.gmra.mrb[8].mxu1 %vm402_vm2, %v2906_v49  ;;  %2451 = vmatmul.mubr.msk.f32.gmra.mrb[24].mxu0 %vm402_vm2, %v2906_v49 }
 0x181   :  { %545 = vmatprep.mubr.f32.mxu1 %v2699_v1  ;;  %706 = vmatprep.mubr.f32.mxu0 %v2699_v1 }
 0x182   :  { %v2934_v54 = vpop.f32.mrb[10].mxu0 }
 0x183   :  { %v2936_v55 = vpop.f32.mrb[11].mxu0 }
 0x184   :  { %2436 = vmatmul.mubr.msk.f32.gmra.mrb[10].mxu1 %vm402_vm2, %v2903_v47  ;;  %2452 = vmatmul.mubr.msk.f32.gmra.mrb[26].mxu0 %vm402_vm2, %v2903_v47 }
 0x185   :  { %551 = vmatprep.mubr.f32.mxu1 %v2699_v1  ;;  %712 = vmatprep.mubr.f32.mxu0 %v2699_v1 }
 0x186   :  { %v2944_v56 = vpop.f32.mrb[12].mxu0 }
 0x187   :  { %v2946_v57 = vpop.f32.mrb[13].mxu0 }
 0x188   :  { %2437 = vmatmul.mubr.msk.f32.gmra.mrb[12].mxu1 %vm402_vm2, %v2916_v51  ;;  %2453 = vmatmul.mubr.msk.f32.gmra.mrb[28].mxu0 %vm402_vm2, %v2916_v51 }
 0x189   :  { %557 = vmatprep.mubr.f32.mxu1 %v2699_v1  ;;  %718 = vmatprep.mubr.f32.mxu0 %v2699_v1 }
 0x18a   :  { %v2954_v58 = vpop.f32.mrb[14].mxu0 }
 0x18b   :  { %v2956_v59 = vpop.f32.mrb[15].mxu0 }
 0x18c   :  { %2438 = vmatmul.mubr.msk.f32.gmra.mrb[14].mxu1 %vm402_vm2, %v2914_v50  ;;  %2454 = vmatmul.mubr.msk.f32.gmra.mrb[30].mxu0 %vm402_vm2, %v2914_v50 }
 0x18d   :  { %563 = vmatprep.mubr.f32.mxu1 %v2699_v1  ;;  %724 = vmatprep.mubr.f32.mxu0 %v2699_v1 }
 0x190   :  { %2439 = vmatmul.mubr.msk.f32.gmra.mrb[16].mxu1 %vm402_vm2, %v2926_v53  ;;  %2455 = vmatmul.mubr.msk.f32.gmra.mrb[32].mxu0 %vm402_vm2, %v2926_v53 }
 0x191   :  { %569 = vmatprep.mubr.f32.mxu1 %v2699_v1  ;;  %730 = vmatprep.mubr.f32.mxu0 %v2699_v1 }
 0x194   :  { %2440 = vmatmul.mubr.msk.f32.gmra.mrb[18].mxu1 %vm402_vm2, %v2924_v52  ;;  %2456 = vmatmul.mubr.msk.f32.gmra.mrb[34].mxu0 %vm402_vm2, %v2924_v52 }
 0x195   :  { %575 = vmatprep.mubr.f32.mxu1 %v2699_v1  ;;  %736 = vmatprep.mubr.f32.mxu0 %v2699_v1 }
 0x198   :  { %2441 = vmatmul.mubr.msk.f32.gmra.mrb[20].mxu1 %vm402_vm2, %v2936_v55  ;;  %2457 = vmatmul.mubr.msk.f32.gmra.mrb[36].mxu0 %vm402_vm2, %v2936_v55 }
 0x199   :  { %581 = vmatprep.mubr.f32.mxu1 %v2699_v1  ;;  %998 = vmatprep.mubr.f32.mxu0 %v2699_v1 }
 0x19c   :  { %2442 = vmatmul.mubr.msk.f32.gmra.mrb[22].mxu1 %vm402_vm2, %v2934_v54  ;;  %2479 = vmatmul.mubr.msk.f32.vlgmr.msra.gmra.mrb[38].mxu0 %vm402_vm2, %v2883_v31 }
 0x19d   :  { %587 = vmatprep.mubr.f32.mxu1 %v2699_v1  ;;  %1004 = vmatprep.mubr.f32.mxu0 %v2699_v1 }
 0x19e   :  { %2651 = vmatpush1.bf16.msra.mxu0 %v2650_v0 }
 0x19f   :  { %2653 = vmatprep.subr.bf16.mxu0 %v2652_v2 }
 0x1a0   :  { %2443 = vmatmul.mubr.msk.f32.gmra.mrb[24].mxu1 %vm402_vm2, %v2946_v57  ;;  %2480 = vmatmul.mubr.msk.f32.gmra.mrb[40].mxu0 %vm402_vm2, %v2881_v30 }
 0x1a1   :  { %593 = vmatprep.mubr.f32.mxu1 %v2699_v1  ;;  %1010 = vmatprep.mubr.f32.mxu0 %v2699_v1 }
 0x1a2   :  { %2655 = vmatpush1.bf16.msra.mxu0 %v2654_v5 }
 0x1a4   :  { %2444 = vmatmul.mubr.msk.f32.gmra.mrb[26].mxu1 %vm402_vm2, %v2944_v56  ;;  %2481 = vmatmul.mubr.msk.f32.gmra.mrb[42].mxu0 %vm402_vm2, %v2895_v41 }
 0x1a5   :  { %599 = vmatprep.mubr.f32.mxu1 %v2699_v1  ;;  %1016 = vmatprep.mubr.f32.mxu0 %v2699_v1 }
 0x1a8   :  { %2445 = vmatmul.mubr.msk.f32.gmra.mrb[28].mxu1 %vm402_vm2, %v2956_v59  ;;  %2482 = vmatmul.mubr.msk.f32.gmra.mrb[44].mxu0 %vm402_vm2, %v2891_v39 }
 0x1a9   :  { %605 = vmatprep.mubr.f32.mxu1 %v2699_v1  ;;  %1022 = vmatprep.mubr.f32.mxu0 %v2699_v1 }
 0x1ac   :  { %2446 = vmatmul.mubr.msk.f32.gmra.mrb[30].mxu1 %vm402_vm2, %v2954_v58  ;;  %2483 = vmatmul.mubr.msk.f32.gmra.mrb[46].mxu0 %vm402_vm2, %v2906_v49 }
 0x1ad   :  { %742 = vmatprep.mubr.f32.mxu1 %v2699_v1  ;;  %1028 = vmatprep.mubr.f32.mxu0 %v2699_v1 }
 0x1b0   :  { %2458 = vmatmul.mubr.msk.f32.vlgmr.msra.gmra.mrb[32].mxu1 %vm402_vm2, %v2934_v54  ;;  %2484 = vmatmul.mubr.msk.f32.gmra.mrb[48].mxu0 %vm402_vm2, %v2903_v47 }
 0x1b1   :  { %2627 = vmatpush1.bf16.msra.mxu1 %v2626_v10  ;;  %748 = vmatprep.mubr.f32.mxu1 %v2699_v1 }
 0x1b2   :  { %1034 = vmatprep.mubr.f32.mxu0 %v2699_v1  ;;  %2629 = vmatprep.subr.bf16.mxu1 %v2628_v11 }
 0x1b4   :  { %2459 = vmatmul.mubr.msk.f32.gmra.mrb[34].mxu1 %vm402_vm2, %v2946_v57  ;;  %2485 = vmatmul.mubr.msk.f32.gmra.mrb[50].mxu0 %vm402_vm2, %v2916_v51 }
 0x1b5   :  { %754 = vmatprep.mubr.f32.mxu1 %v2699_v1  ;;  %1040 = vmatprep.mubr.f32.mxu0 %v2699_v1 }
 0x1b6   :  { %2631 = vmatpush1.bf16.msra.mxu1 %v2630_v16 }
 0x1b7   :  { %2641 = vmatprep.subr.bf16.mxu1 %v2640_v17 }
 0x1b8   :  { %2460 = vmatmul.mubr.msk.f32.gmra.mrb[36].mxu1 %vm402_vm2, %v2944_v56  ;;  %2486 = vmatmul.mubr.msk.f32.gmra.mrb[52].mxu0 %vm402_vm2, %v2914_v50 }
 0x1b9   :  { %760 = vmatprep.mubr.f32.mxu1 %v2699_v1  ;;  %1046 = vmatprep.mubr.f32.mxu0 %v2699_v1 }
 0x1bc   :  { %2461 = vmatmul.mubr.msk.f32.gmra.mrb[38].mxu1 %vm402_vm2, %v2956_v59  ;;  %2487 = vmatmul.mubr.msk.f32.gmra.mrb[54].mxu0 %vm402_vm2, %v2926_v53 }
 0x1bd   :  { %766 = vmatprep.mubr.f32.mxu1 %v2699_v1  ;;  %1052 = vmatprep.mubr.f32.mxu0 %v2699_v1 }
 0x1c0   :  { %2462 = vmatmul.mubr.msk.f32.gmra.mrb[40].mxu1 %vm402_vm2, %v2954_v58  ;;  %2488 = vmatmul.mubr.msk.f32.gmra.mrb[56].mxu0 %vm402_vm2, %v2924_v52 }
 0x1c1   :  { %837 = vmatprep.mubr.f32.mxu1 %v2699_v1  ;;  %1058 = vmatprep.mubr.f32.mxu0 %v2699_v1 }
 0x1c4   :  { %2463 = vmatmul.mubr.msk.f32.vlgmr.msra.gmra.mrb[42].mxu1 %vm402_vm2, %v2883_v31  ;;  %2489 = vmatmul.mubr.msk.f32.gmra.mrb[58].mxu0 %vm402_vm2, %v2936_v55 }
 0x1c5   :  { %2643 = vmatpush1.bf16.msra.mxu1 %v2642_v22  ;;  %843 = vmatprep.mubr.f32.mxu1 %v2699_v1 }
 0x1c6   :  { %1064 = vmatprep.mubr.f32.mxu0 %v2699_v1  ;;  %2645 = vmatprep.subr.bf16.mxu1 %v2644_v23 }
 0x1c8   :  { %2464 = vmatmul.mubr.msk.f32.gmra.mrb[44].mxu1 %vm402_vm2, %v2881_v30  ;;  %2490 = vmatmul.mubr.msk.f32.gmra.mrb[60].mxu0 %vm402_vm2, %v2934_v54 }
 0x1c9   :  { %849 = vmatprep.mubr.f32.mxu1 %v2699_v1  ;;  %1070 = vmatprep.mubr.f32.mxu0 %v2699_v1 }
 0x1ca   :  { %2647 = vmatpush1.bf16.msra.mxu1 %v2646_v26 }
 0x1cc   :  { %2465 = vmatmul.mubr.msk.f32.gmra.mrb[46].mxu1 %vm402_vm2, %v2895_v41  ;;  %2491 = vmatmul.mubr.msk.f32.gmra.mrb[62].mxu0 %vm402_vm2, %v2946_v57 }
 0x1cd   :  { %855 = vmatprep.mubr.f32.mxu1 %v2699_v1  ;;  %1076 = vmatprep.mubr.f32.mxu0 %v2699_v1 }
 0x1d0   :  { %2466 = vmatmul.mubr.msk.f32.gmra.mrb[48].mxu1 %vm402_vm2, %v2891_v39  ;;  %2492 = vmatmul.mubr.msk.f32.gmra.mrb[64].mxu0 %vm402_vm2, %v2944_v56 }
 0x1d1   :  { %861 = vmatprep.mubr.f32.mxu1 %v2699_v1  ;;  %1082 = vmatprep.mubr.f32.mxu0 %v2699_v1 }
 0x1d4   :  { %2467 = vmatmul.mubr.msk.f32.gmra.mrb[50].mxu1 %vm402_vm2, %v2906_v49  ;;  %2493 = vmatmul.mubr.msk.f32.gmra.mrb[66].mxu0 %vm402_vm2, %v2956_v59 }
 0x1d5   :  { %867 = vmatprep.mubr.f32.mxu1 %v2699_v1  ;;  %1088 = vmatprep.mubr.f32.mxu0 %v2699_v1 }
 0x1d8   :  { %2468 = vmatmul.mubr.msk.f32.gmra.mrb[52].mxu1 %vm402_vm2, %v2903_v47  ;;  %2494 = vmatmul.mubr.msk.f32.gmra.mrb[68].mxu0 %vm402_vm2, %v2954_v58 }
 0x1d9   :  { %873 = vmatprep.mubr.f32.mxu1 %v2699_v1  ;;  %1320 = vmatprep.mubr.f32.mxu0 %v2699_v1 }
 0x1dc   :  { %2469 = vmatmul.mubr.msk.f32.gmra.mrb[54].mxu1 %vm402_vm2, %v2916_v51  ;;  %2511 = vmatmul.mubr.msk.f32.vlgmr.msra.gmra.mrb[70].mxu0 %vm402_vm2, %v2883_v31 }
 0x1dd   :  { %879 = vmatprep.mubr.f32.mxu1 %v2699_v1  ;;  %1326 = vmatprep.mubr.f32.mxu0 %v2699_v1 }
 0x1e0   :  { %2470 = vmatmul.mubr.msk.f32.gmra.mrb[56].mxu1 %vm402_vm2, %v2914_v50  ;;  %2512 = vmatmul.mubr.msk.f32.gmra.mrb[72].mxu0 %vm402_vm2, %v2881_v30 }
 0x1e1   :  { %885 = vmatprep.mubr.f32.mxu1 %v2699_v1  ;;  %1332 = vmatprep.mubr.f32.mxu0 %v2699_v1 }
 0x1e4   :  { %2471 = vmatmul.mubr.msk.f32.gmra.mrb[58].mxu1 %vm402_vm2, %v2926_v53  ;;  %2513 = vmatmul.mubr.msk.f32.gmra.mrb[74].mxu0 %vm402_vm2, %v2895_v41 }
 0x1e5   :  { %891 = vmatprep.mubr.f32.mxu1 %v2699_v1  ;;  %1338 = vmatprep.mubr.f32.mxu0 %v2699_v1 }
 0x1e8   :  { %2472 = vmatmul.mubr.msk.f32.gmra.mrb[60].mxu1 %vm402_vm2, %v2924_v52  ;;  %2514 = vmatmul.mubr.msk.f32.gmra.mrb[76].mxu0 %vm402_vm2, %v2891_v39 }
 0x1e9   :  { %897 = vmatprep.mubr.f32.mxu1 %v2699_v1  ;;  %1344 = vmatprep.mubr.f32.mxu0 %v2699_v1 }
 0x1ec   :  { %2473 = vmatmul.mubr.msk.f32.gmra.mrb[62].mxu1 %vm402_vm2, %v2936_v55  ;;  %2515 = vmatmul.mubr.msk.f32.gmra.mrb[78].mxu0 %vm402_vm2, %v2906_v49 }
 0x1ed   :  { %903 = vmatprep.mubr.f32.mxu1 %v2699_v1  ;;  %1350 = vmatprep.mubr.f32.mxu0 %v2699_v1 }
 0x1f0   :  { %2474 = vmatmul.mubr.msk.f32.gmra.mrb[64].mxu1 %vm402_vm2, %v2934_v54  ;;  %2516 = vmatmul.mubr.msk.f32.gmra.mrb[80].mxu0 %vm402_vm2, %v2903_v47 }
 0x1f1   :  { %909 = vmatprep.mubr.f32.mxu1 %v2699_v1  ;;  %1356 = vmatprep.mubr.f32.mxu0 %v2699_v1 }
 0x1f4   :  { %2475 = vmatmul.mubr.msk.f32.gmra.mrb[66].mxu1 %vm402_vm2, %v2946_v57  ;;  %2517 = vmatmul.mubr.msk.f32.gmra.mrb[82].mxu0 %vm402_vm2, %v2916_v51 }
 0x1f5   :  { %915 = vmatprep.mubr.f32.mxu1 %v2699_v1  ;;  %1362 = vmatprep.mubr.f32.mxu0 %v2699_v1 }
 0x1f8   :  { %2476 = vmatmul.mubr.msk.f32.gmra.mrb[68].mxu1 %vm402_vm2, %v2944_v56  ;;  %2518 = vmatmul.mubr.msk.f32.gmra.mrb[84].mxu0 %vm402_vm2, %v2914_v50 }
 0x1f9   :  { %921 = vmatprep.mubr.f32.mxu1 %v2699_v1  ;;  %1368 = vmatprep.mubr.f32.mxu0 %v2699_v1 }
 0x1fc   :  { %2477 = vmatmul.mubr.msk.f32.gmra.mrb[70].mxu1 %vm402_vm2, %v2956_v59  ;;  %2519 = vmatmul.mubr.msk.f32.gmra.mrb[86].mxu0 %vm402_vm2, %v2926_v53 }
 0x1fd   :  { %927 = vmatprep.mubr.f32.mxu1 %v2699_v1  ;;  %1374 = vmatprep.mubr.f32.mxu0 %v2699_v1 }
 0x200   :  { %2478 = vmatmul.mubr.msk.f32.gmra.mrb[72].mxu1 %vm402_vm2, %v2954_v58  ;;  %2520 = vmatmul.mubr.msk.f32.gmra.mrb[88].mxu0 %vm402_vm2, %v2924_v52 }
 0x201   :  { %1159 = vmatprep.mubr.f32.mxu1 %v2699_v1  ;;  %1380 = vmatprep.mubr.f32.mxu0 %v2699_v1 }
 0x204   :  { %2495 = vmatmul.mubr.msk.f32.vlgmr.msra.gmra.mrb[74].mxu1 %vm402_vm2, %v2883_v31  ;;  %2521 = vmatmul.mubr.msk.f32.gmra.mrb[90].mxu0 %vm402_vm2, %v2936_v55 }
 0x205   :  { %1165 = vmatprep.mubr.f32.mxu1 %v2699_v1  ;;  %1386 = vmatprep.mubr.f32.mxu0 %v2699_v1 }
 0x208   :  { %2496 = vmatmul.mubr.msk.f32.gmra.mrb[76].mxu1 %vm402_vm2, %v2881_v30  ;;  %2522 = vmatmul.mubr.msk.f32.gmra.mrb[92].mxu0 %vm402_vm2, %v2934_v54 }
 0x209   :  { %1171 = vmatprep.mubr.f32.mxu1 %v2699_v1  ;;  %1392 = vmatprep.mubr.f32.mxu0 %v2699_v1 }
 0x20c   :  { %2497 = vmatmul.mubr.msk.f32.gmra.mrb[78].mxu1 %vm402_vm2, %v2895_v41  ;;  %2523 = vmatmul.mubr.msk.f32.gmra.mrb[94].mxu0 %vm402_vm2, %v2946_v57 }
 0x20d   :  { %1177 = vmatprep.mubr.f32.mxu1 %v2699_v1  ;;  %1398 = vmatprep.mubr.f32.mxu0 %v2699_v1 }
 0x210   :  { %2498 = vmatmul.mubr.msk.f32.gmra.mrb[80].mxu1 %vm402_vm2, %v2891_v39  ;;  %2524 = vmatmul.mubr.msk.f32.gmra.mrb[96].mxu0 %vm402_vm2, %v2944_v56 }
 0x211   :  { %1183 = vmatprep.mubr.f32.mxu1 %v2699_v1  ;;  %1404 = vmatprep.mubr.f32.mxu0 %v2699_v1 }
 0x214   :  { %2499 = vmatmul.mubr.msk.f32.gmra.mrb[82].mxu1 %vm402_vm2, %v2906_v49  ;;  %2525 = vmatmul.mubr.msk.f32.gmra.mrb[98].mxu0 %vm402_vm2, %v2956_v59 }
 0x215   :  { %1189 = vmatprep.mubr.f32.mxu1 %v2699_v1  ;;  %1410 = vmatprep.mubr.f32.mxu0 %v2699_v1 }
 0x218   :  { %2500 = vmatmul.mubr.msk.f32.gmra.mrb[84].mxu1 %vm402_vm2, %v2903_v47  ;;  %2526 = vmatmul.mubr.msk.f32.gmra.mrb[100].mxu0 %vm402_vm2, %v2954_v58 }
 0x219   :  { %1195 = vmatprep.mubr.f32.mxu1 %v2699_v1 }
 0x21c   :  { %2501 = vmatmul.mubr.msk.f32.gmra.mrb[86].mxu1 %vm402_vm2, %v2916_v51 }
 0x21d   :  { %1201 = vmatprep.mubr.f32.mxu1 %v2699_v1 }
 0x220   :  { %2502 = vmatmul.mubr.msk.f32.gmra.mrb[88].mxu1 %vm402_vm2, %v2914_v50 }
 0x221   :  { %1207 = vmatprep.mubr.f32.mxu1 %v2699_v1 }
 0x224   :  { %2503 = vmatmul.mubr.msk.f32.gmra.mrb[90].mxu1 %vm402_vm2, %v2926_v53 }
 0x225   :  { %1213 = vmatprep.mubr.f32.mxu1 %v2699_v1 }
 0x228   :  { %2504 = vmatmul.mubr.msk.f32.gmra.mrb[92].mxu1 %vm402_vm2, %v2924_v52 }
 0x229   :  { %1219 = vmatprep.mubr.f32.mxu1 %v2699_v1 }
 0x22c   :  { %2505 = vmatmul.mubr.msk.f32.gmra.mrb[94].mxu1 %vm402_vm2, %v2936_v55 }
 0x22d   :  { %1225 = vmatprep.mubr.f32.mxu1 %v2699_v1 }
 0x230   :  { %2506 = vmatmul.mubr.msk.f32.gmra.mrb[96].mxu1 %vm402_vm2, %v2934_v54 }
 0x231   :  { %1231 = vmatprep.mubr.f32.mxu1 %v2699_v1 }
 0x234   :  { %2507 = vmatmul.mubr.msk.f32.gmra.mrb[98].mxu1 %vm402_vm2, %v2946_v57 }
 0x235   :  { %1237 = vmatprep.mubr.f32.mxu1 %v2699_v1 }
 0x238   :  { %2508 = vmatmul.mubr.msk.f32.gmra.mrb[100].mxu1 %vm402_vm2, %v2944_v56 }
 0x239   :  { %1243 = vmatprep.mubr.f32.mxu1 %v2699_v1 }
 0x23c   :  { %2509 = vmatmul.mubr.msk.f32.gmra.mrb[102].mxu1 %vm402_vm2, %v2956_v59 }
 0x23d   :  { %1249 = vmatprep.mubr.f32.mxu1 %v2699_v1 }
 0x240   :  { %2510 = vmatmul.mubr.msk.f32.gmra.mrb[104].mxu1 %vm402_vm2, %v2954_v58 }
 0x243   :  { %v517_v27 = vpop.f32.mrb[0].mxu1  ;;  %v678_v28 = vpop.f32.mrb[16].mxu0 }
 0x244   :  { %v519_v29 = vpop.f32.mrb[1].mxu1  ;;  %v3202_v30 = vpop.f32.mrb[17].mxu0  ;;  %v1509_v33 = vrot.slane %v678_v28, 2 }
 0x245   :  { %v1436_v37 = vrot.slane %v519_v29, 1 }
 0x247   :  { %v523_v31 = vpop.f32.mrb[2].mxu1  ;;  %v684_v32 = vpop.f32.mrb[18].mxu0 }
 0x248   :  { %v1510_v34 = vrot.slane %v684_v32, 2  ;;  %v525_v35 = vpop.f32.mrb[3].mxu1  ;;  %v3204_v36 = vpop.f32.mrb[19].mxu0 }
 0x249   :  { %v1437_v38 = vrot.slane %v525_v35, 1 }
 0x24a   :  { %v1511_v1 = vsel %vm1508_vm0, %v1509_v33, %v1510_v34 }
 0x24b   :  { %v1438_v39 = vsel %vm1435_vm3, %v1436_v37, %v1437_v38  ;;  %v1477_v40 = vadd.f32 %v1437_v38, %v523_v31  ;;  %v529_v41 = vpop.f32.mrb[4].mxu1  ;;  %v690_v42 = vpop.f32.mrb[20].mxu0 }
 0x24c   :  { %v1476_v43 = vadd.f32 %v1438_v39, %v517_v27  ;;  %v531_v44 = vpop.f32.mrb[5].mxu1  ;;  %v3208_v46 = vpop.f32.mrb[21].mxu0  ;;  %v1512_v53 = vrot.slane %v690_v42, 2 }
 0x24d   :  { %v1550_v47 = vadd.f32 %v1510_v34, %v1477_v40  ;;  %v1439_v57 = vrot.slane %v531_v44, 1 }
 0x24e   :  { %v1549_v48 = vadd.f32 %v1511_v1, %v1476_v43 }
 0x24f   :  { %v1565_v49 = vsel %vm1508_vm0, %v1550_v47, -inf  ;;  %v535_v50 = vpop.f32.mrb[6].mxu1  ;;  %v696_v51 = vpop.f32.mrb[22].mxu0 }
 0x250   :  { %v3211_v52 = vmax.f32 %v1549_v48, %v1565_v49  ;;  %v1513_v54 = vrot.slane %v696_v51, 2  ;;  %v537_v55 = vpop.f32.mrb[7].mxu1  ;;  %v3213_v56 = vpop.f32.mrb[23].mxu0 }
 0x251   :  { %v1440_v58 = vrot.slane %v537_v55, 1 }
 0x252   :  { %v1514_v59 = vsel %vm1508_vm0, %v1512_v53, %v1513_v54 }
 0x253   :  { %v1441_v60 = vsel %vm1435_vm3, %v1439_v57, %v1440_v58  ;;  %v1479_v61 = vadd.f32 %v1440_v58, %v535_v50  ;;  %v541_v62 = vpop.f32.mrb[8].mxu1  ;;  %v702_v63 = vpop.f32.mrb[24].mxu0 }
 0x254   :  { %v1478_v0 = vadd.f32 %v1441_v60, %v529_v41  ;;  %v543_v2 = vpop.f32.mrb[9].mxu1  ;;  %v3217_v3 = vpop.f32.mrb[25].mxu0  ;;  %v1515_v10 = vrot.slane %v702_v63, 2 }
 0x255   :  { %v1552_v4 = vadd.f32 %v1513_v54, %v1479_v61  ;;  %v1442_v14 = vrot.slane %v543_v2, 1 }
 0x256   :  { %v1551_v5 = vadd.f32 %v1514_v59, %v1478_v0 }
 0x257   :  { %v1573_v6 = vsel %vm1508_vm0, %v1552_v4, -inf  ;;  %v547_v7 = vpop.f32.mrb[10].mxu1  ;;  %v708_v8 = vpop.f32.mrb[26].mxu0 }
 0x258   :  { %v3220_v9 = vmax.f32 %v1551_v5, %v1573_v6  ;;  %v1516_v11 = vrot.slane %v708_v8, 2  ;;  %v549_v12 = vpop.f32.mrb[11].mxu1  ;;  %v3222_v13 = vpop.f32.mrb[27].mxu0 }
 0x259   :  { %v1443_v15 = vrot.slane %v549_v12, 1 }
 0x25a   :  { %v1517_v16 = vsel %vm1508_vm0, %v1515_v10, %v1516_v11 }
 0x25b   :  { %v1444_v17 = vsel %vm1435_vm3, %v1442_v14, %v1443_v15  ;;  %v1481_v18 = vadd.f32 %v1443_v15, %v547_v7  ;;  %v553_v19 = vpop.f32.mrb[12].mxu1  ;;  %v714_v20 = vpop.f32.mrb[28].mxu0 }
 0x25c   :  { %v1480_v21 = vadd.f32 %v1444_v17, %v541_v62  ;;  %v555_v22 = vpop.f32.mrb[13].mxu1  ;;  %v3226_v23 = vpop.f32.mrb[29].mxu0  ;;  %v1518_v31 = vrot.slane %v714_v20, 2 }
 0x25d   :  { %v1554_v24 = vadd.f32 %v1516_v11, %v1481_v18  ;;  %v1445_v35 = vrot.slane %v555_v22, 1 }
 0x25e   :  { %v1553_v25 = vadd.f32 %v1517_v16, %v1480_v21 }
 0x25f   :  { %v1581_v26 = vsel %vm1508_vm0, %v1554_v24, -inf  ;;  %v559_v27 = vpop.f32.mrb[14].mxu1  ;;  %v720_v28 = vpop.f32.mrb[30].mxu0 }
 0x260   :  { %v3229_v29 = vmax.f32 %v1553_v25, %v1581_v26  ;;  %v1519_v32 = vrot.slane %v720_v28, 2  ;;  %v561_v33 = vpop.f32.mrb[15].mxu1  ;;  %v3231_v34 = vpop.f32.mrb[31].mxu0 }
 0x261   :  { %v1446_v37 = vrot.slane %v561_v33, 1 }
 0x262   :  { %v1520_v38 = vsel %vm1508_vm0, %v1518_v31, %v1519_v32 }
 0x263   :  { %v1447_v1 = vsel %vm1435_vm3, %v1445_v35, %v1446_v37  ;;  %v1483_v39 = vadd.f32 %v1446_v37, %v559_v27  ;;  %v565_v40 = vpop.f32.mrb[16].mxu1  ;;  %v726_v41 = vpop.f32.mrb[32].mxu0 }
 0x264   :  { %v1482_v42 = vadd.f32 %v1447_v1, %v553_v19  ;;  %v567_v43 = vpop.f32.mrb[17].mxu1  ;;  %v3235_v44 = vpop.f32.mrb[33].mxu0  ;;  %v1521_v54 = vrot.slane %v726_v41, 2 }
 0x265   :  { %v1556_v47 = vadd.f32 %v1519_v32, %v1483_v39  ;;  %v1448_v59 = vrot.slane %v567_v43, 1 }
 0x266   :  { %v1555_v48 = vadd.f32 %v1520_v38, %v1482_v42 }
 0x267   :  { %v1589_v49 = vsel %vm1508_vm0, %v1556_v47, -inf  ;;  %v571_v50 = vpop.f32.mrb[18].mxu1  ;;  %v732_v51 = vpop.f32.mrb[34].mxu0 }
 0x268   :  { %v3238_v53 = vmax.f32 %v1555_v48, %v1589_v49  ;;  %v1522_v55 = vrot.slane %v732_v51, 2  ;;  %v573_v57 = vpop.f32.mrb[19].mxu1  ;;  %v3240_v58 = vpop.f32.mrb[35].mxu0 }
 0x269   :  { %v1449_v60 = vrot.slane %v573_v57, 1 }
 0x26a   :  { %v1523_v61 = vsel %vm1508_vm0, %v1521_v54, %v1522_v55 }
 0x26b   :  { %v1450_v62 = vsel %vm1435_vm3, %v1448_v59, %v1449_v60  ;;  %v1485_v63 = vadd.f32 %v1449_v60, %v571_v50  ;;  %v577_v0 = vpop.f32.mrb[20].mxu1  ;;  %v738_v2 = vpop.f32.mrb[36].mxu0 }
 0x26c   :  { %v1484_v4 = vadd.f32 %v1450_v62, %v565_v40  ;;  %v579_v5 = vpop.f32.mrb[21].mxu1  ;;  %v3244_v6 = vpop.f32.mrb[37].mxu0  ;;  %v1524_v62 = vrot.slane %v738_v2, 2 }
 0x26d   :  { %v1558_v7 = vadd.f32 %v1522_v55, %v1485_v63  ;;  %v1451_v17 = vrot.slane %v579_v5, 1 }
 0x26e   :  { %v1557_v8 = vadd.f32 %v1523_v61, %v1484_v4 }
 0x26f   :  { %v1597_v10 = vsel %vm1508_vm0, %v1558_v7, -inf  ;;  %v583_v11 = vpop.f32.mrb[22].mxu1  ;;  %v1000_v12 = vpop.f32.mrb[38].mxu0 }
 0x270   :  { %v3247_v14 = vmax.f32 %v1557_v8, %v1597_v10  ;;  %v585_v15 = vpop.f32.mrb[23].mxu1  ;;  %v3249_v16 = vpop.f32.mrb[39].mxu0  ;;  %v1814_v24 = vrot.slane %v1000_v12, 3 }
 0x271   :  { %3848 = vst [vmem:[#allocation6_spill] sm:$0xff] %v3249_v16  ;;  %v1452_v18 = vrot.slane %v585_v15, 1 }
 0x273   :  { %v1453_v19 = vsel %vm1435_vm3, %v1451_v17, %v1452_v18  ;;  %v1487_v20 = vadd.f32 %v1452_v18, %v583_v11  ;;  %v589_v21 = vpop.f32.mrb[24].mxu1  ;;  %v3252_v22 = vpop.f32.mrb[40].mxu0 }
 0x274   :  { %v1486_v25 = vadd.f32 %v1453_v19, %v577_v0  ;;  %v3830_v26 = vrot.slane %v3252_v22, 3  ;;  %v591_v27 = vpop.f32.mrb[25].mxu1  ;;  %v3255_v28 = vpop.f32.mrb[41].mxu0 }
 0x275   :  { %v1454_v38 = vrot.slane %v591_v27, 1 }
 0x276   :  { %v3260_v31 = vsel %vm1813_vm4, %v1814_v24, %v3830_v26 }
 0x277   :  { %v595_v32 = vpop.f32.mrb[26].mxu1  ;;  %v1012_v33 = vpop.f32.mrb[42].mxu0 }
 0x278   :  { %v597_v35 = vpop.f32.mrb[27].mxu1  ;;  %v3262_v37 = vpop.f32.mrb[43].mxu0  ;;  %v1817_v43 = vrot.slane %v1012_v33, 3 }
 0x279   :  { %3849 = vst [vmem:[#allocation7_spill] sm:$0xff] %v3262_v37  ;;  %v1455_v1 = vrot.slane %v597_v35, 1  ;;  %v1567_v35 = vrot.slane %v3211_v52, 4 }
 0x27b   :  { %v1456_v39 = vsel %vm1435_vm3, %v1454_v38, %v1455_v1  ;;  %v1489_v40 = vadd.f32 %v1455_v1, %v595_v32  ;;  %v601_v41 = vpop.f32.mrb[28].mxu1  ;;  %v3265_v42 = vpop.f32.mrb[44].mxu0 }
 0x27c   :  { %v1488_v47 = vadd.f32 %v1456_v39, %v589_v21  ;;  %v3829_v48 = vrot.slane %v3265_v42, 3  ;;  %v603_v49 = vpop.f32.mrb[29].mxu1  ;;  %v3268_v50 = vpop.f32.mrb[45].mxu0 }
 0x27d   :  { %3850 = vst [vmem:[#allocation8_spill] sm:$0xff] %v3268_v50  ;;  %v1457_v60 = vrot.slane %v603_v49, 1 }
 0x27e   :  { %v3273_v51 = vsel %vm1813_vm4, %v1817_v43, %v3829_v48 }
 0x27f   :  { %v607_v54 = vpop.f32.mrb[30].mxu1  ;;  %v1024_v55 = vpop.f32.mrb[46].mxu0 }
 0x280   :  { %v609_v57 = vpop.f32.mrb[31].mxu1  ;;  %v3275_v59 = vpop.f32.mrb[47].mxu0  ;;  %v1820_v7 = vrot.slane %v1024_v55, 3  ;;  %v1568_v55 = vmax.f32 %v3211_v52, %v1567_v35 }
 0x281   :  { %3851 = vst [vmem:[#allocation9_spill] sm:$0xff] %v3275_v59  ;;  %v1458_v61 = vrot.slane %v609_v57, 1 }
 0x283   :  { %v1459_v63 = vsel %vm1435_vm3, %v1457_v60, %v1458_v61  ;;  %v1491_v0 = vadd.f32 %v1458_v61, %v607_v54  ;;  %v744_v4 = vpop.f32.mrb[32].mxu1  ;;  %v3278_v5 = vpop.f32.mrb[48].mxu0 }
 0x284   :  { %v1490_v8 = vadd.f32 %v1459_v63, %v601_v41  ;;  %v1525_v10 = vrot.slane %v744_v4, 2  ;;  %v3828_v11 = vrot.slane %v3278_v5, 3  ;;  %v3281_v12 = vpop.f32.mrb[33].mxu1  ;;  %v3283_v15 = vpop.f32.mrb[49].mxu0  ;;  %v1583_v63 = vrot.slane %v3229_v29, 4 }
 0x285   :  { %3852 = vst [vmem:[#allocation10_spill] sm:$0xff] %v3283_v15 }
 0x286   :  { %v1526_v17 = vsel %vm1508_vm0, %v1524_v62, %v1525_v10  ;;  %v1560_v18 = vadd.f32 %v1525_v10, %v1487_v20  ;;  %v3289_v2 = vsel %vm1813_vm4, %v1820_v7, %v3828_v11  ;;  %v1575_v62 = vrot.slane %v3220_v9, 4 }
 0x287   :  { %v1559_v19 = vadd.f32 %v1526_v17, %v1486_v25  ;;  %v750_v21 = vpop.f32.mrb[34].mxu1  ;;  %v1036_v24 = vpop.f32.mrb[50].mxu0  ;;  %v1584_v35 = vmax.f32 %v3229_v29, %v1583_v63 }
 0x288   :  { %v1605_v27 = vsel %vm1508_vm0, %v1560_v18, -inf  ;;  %v3292_v32 = vpop.f32.mrb[35].mxu1  ;;  %v3294_v33 = vpop.f32.mrb[51].mxu0  ;;  %v1527_v39 = vrot.slane %v750_v21, 2  ;;  %v1823_v41 = vrot.slane %v1036_v24, 3  ;;  %v1599_v24 = vrot.slane %v3247_v14, 4 }
 0x289   :  { %3853 = vst [vmem:[#allocation11_spill] sm:$0xff] %v3294_v33  ;;  %v3297_v38 = vmax.f32 %v1559_v19, %v1605_v27  ;;  %v1569_v19 = vrot.slane %v1568_v55, 2  ;;  %v3325_v27 = vshrl.u32 %v54_v45, 7 }
 0x28a   :  { %v1600_v11 = vmax.f32 %v3247_v14, %v1599_v24 }
 0x28b   :  { %v756_v1 = vpop.f32.mrb[36].mxu1  ;;  %v3299_v20 = vpop.f32.mrb[52].mxu0  ;;  %v1631_v63 = vsub.s32 0, %v3325_v27 }
 0x28c   :  { %v1528_v43 = vrot.slane %v756_v1, 2  ;;  %v3827_v25 = vrot.slane %v3299_v20, 3  ;;  %v3302_v49 = vpop.f32.mrb[37].mxu1  ;;  %v3304_v54 = vpop.f32.mrb[53].mxu0 }
 0x28d   :  { %3854 = vst [vmem:[#allocation12_spill] sm:$0xff] %v3304_v54 }
 0x28e   :  { %v1529_v57 = vsel %vm1508_vm0, %v1527_v39, %v1528_v43  ;;  %v1562_v60 = vadd.f32 %v1528_v43, %v1489_v40  ;;  %v3311_v61 = vsel %vm1813_vm4, %v1823_v41, %v3827_v25  ;;  %v1591_v40 = vrot.slane %v3238_v53, 4 }
 0x28f   :  { %v1561_v4 = vadd.f32 %v1529_v57, %v1488_v47  ;;  %v762_v7 = vpop.f32.mrb[38].mxu1  ;;  %v1048_v10 = vpop.f32.mrb[54].mxu0  ;;  %v1576_v47 = vmax.f32 %v3220_v9, %v1575_v62 }
 0x290   :  { %v1613_v17 = vsel %vm1508_vm0, %v1562_v60, -inf  ;;  %v3316_v18 = vpop.f32.mrb[39].mxu1  ;;  %v3318_v52 = vpop.f32.mrb[55].mxu0  ;;  %v1530_v41 = vrot.slane %v762_v7, 2  ;;  %v1826_v43 = vrot.slane %v1048_v10, 3  ;;  %v1592_v45 = vmax.f32 %v3238_v53, %v1591_v40 }
 0x291   :  { %3855 = vst [vmem:[#allocation13_spill] sm:$0xff] %v3318_v52  ;;  %v3321_v21 = vmax.f32 %v1561_v4, %v1613_v17  ;;  %v1570_v17 = vmax.f32 %v1568_v55, %v1569_v19  ;;  %v1577_v7 = vrot.slane %v1576_v47, 2  ;;  %v1585_v10 = vrot.slane %v1584_v35, 2  ;;  %v3348_v53 = vld [vmem:[%s3823_s3] sm:$0x7] }
 0x292   :  { %v1593_v40 = vrot.slane %v1592_v45, 2 }
 0x293   :  { %v768_v1 = vpop.f32.mrb[40].mxu1  ;;  %v3329_v39 = vpop.f32.mrb[56].mxu0  ;;  %v1571_v19 = vrot.slane %v1570_v17, 1 }
 0x294   :  { %v1531_v57 = vrot.slane %v768_v1, 2  ;;  %v3831_v60 = vrot.slane %v3329_v39, 3  ;;  %v3332_v25 = vpop.f32.mrb[41].mxu1  ;;  %v3334_v4 = vpop.f32.mrb[57].mxu0 }
 0x295   :  { %3856 = vst [vmem:[#allocation14_spill] sm:$0xff] %v3334_v4  ;;  %v1572_v59 = vmax.f32 %v1570_v17, %v1571_v19 }
 0x296   :  { %v1532_v9 = vsel %vm1508_vm0, %v1530_v41, %v1531_v57  ;;  %v1564_v29 = vadd.f32 %v1531_v57, %v1491_v0  ;;  %v3342_v62 = vsel %vm1813_vm4, %v1826_v43, %v3831_v60  ;;  %v1601_v41 = vrot.slane %v1600_v11, 2 }
 0x297   :  { %v1563_v1 = vadd.f32 %v1532_v9, %v1490_v8  ;;  %v839_v48 = vpop.f32.mrb[42].mxu1  ;;  %v1060_v26 = vpop.f32.mrb[58].mxu0  ;;  %v3356_v43 = vrot.slane %v3348_v53, %v1631_v63  ;;  %v1578_v8 = vmax.f32 %v1576_v47, %v1577_v7  ;;  %v1586_v57 = vmax.f32 %v1584_v35, %v1585_v10  ;;  %v3366_v47 = vld [vmem:[%s3824_s4] sm:$0x7] }
 0x298   :  { %v1621_v14 = vsel %vm1508_vm0, %v1564_v29, -inf  ;;  %v841_v0 = vpop.f32.mrb[43].mxu1  ;;  %v3351_v55 = vpop.f32.mrb[59].mxu0  ;;  %v1669_v52 = vrot.slane %v839_v48, 1  ;;  %v1829_v4 = vrot.slane %v1060_v26, 3  ;;  %3859 = vst [vmem:[#allocation17_spill] sm:$0xff] %v3366_v47  ;;  %v1602_v35 = vmax.f32 %v1600_v11, %v1601_v41 }
 0x299   :  { %3857 = vst [vmem:[#allocation15_spill] sm:$0xff] %v3351_v55  ;;  %v3353_v24 = vmax.f32 %v1563_v1, %v1621_v14  ;;  %v1594_v1 = vmax.f32 %v1592_v45, %v1593_v40  ;;  %v1741_v14 = vrot.slane %v841_v0, 2  ;;  %v1579_v10 = vrot.slane %v1578_v8, 1 }
 0x29a   :  { %v1587_v17 = vrot.slane %v1586_v57, 1  ;;  %v1603_v41 = vrot.slane %v1602_v35, 1 }
 0x29b   :  { %v845_v9 = vpop.f32.mrb[44].mxu1  ;;  %v3358_v60 = vpop.f32.mrb[60].mxu0 }
 0x29c   :  { %v1670_v33 = vrot.slane %v845_v9, 1  ;;  %v3832_v29 = vrot.slane %v3358_v60, 3  ;;  %v847_v54 = vpop.f32.mrb[45].mxu1  ;;  %v3361_v55 = vpop.f32.mrb[61].mxu0 }
 0x29d   :  { %3858 = vst [vmem:[#allocation16_spill] sm:$0xff] %v3361_v55  ;;  %v1742_v15 = vrot.slane %v847_v54, 2 }
 0x29e   :  { %v1671_v7 = vsel %vm1435_vm3, %v1669_v52, %v1670_v33  ;;  %v1710_v26 = vadd.f32 %v1670_v33, %v3204_v36  ;;  %v3373_v48 = vsel %vm1813_vm4, %v1829_v4, %v3832_v29  ;;  %v3380_v52 = vrot.slane %v3366_v47, %v1631_v63 }
 0x29f   :  { %v1709_v45 = vadd.f32 %v1671_v7, %v3202_v30  ;;  %v1743_v54 = vsel %vm1508_vm0, %v1741_v14, %v1742_v15  ;;  %v851_v0 = vpop.f32.mrb[46].mxu1  ;;  %v1072_v19 = vpop.f32.mrb[62].mxu0  ;;  %v1595_v36 = vrot.slane %v1594_v1, 1  ;;  %v1633_v4 = vadd.f32 %v3356_v43, %v1572_v59 }
 0x2a0   :  { %v1782_v40 = vadd.f32 %v1742_v15, %v1710_v26  ;;  %v853_v9 = vpop.f32.mrb[47].mxu1  ;;  %v3377_v11 = vpop.f32.mrb[63].mxu0  ;;  %v3861_v29 = vrot.slane %v3252_v22, 3  ;;  %v1936_v30 = vsub.s32 1, %v3325_v27  ;;  %v1580_v14 = vmax.f32 %v1578_v8, %v1579_v10 }
 0x2a1   :  { %3860 = vst [vmem:[#allocation18_spill] sm:$0xff] %v3377_v11  ;;  %v1781_v33 = vadd.f32 %v1743_v54, %v1709_v45  ;;  %v1588_v7 = vmax.f32 %v1586_v57, %v1587_v17  ;;  %v1672_v26 = vrot.slane %v851_v0, 1  ;;  %v1832_v50 = vrot.slane %v1072_v19, 3 }
 0x2a2   :  { %v1855_v55 = vadd.f32 %v3861_v29, %v1782_v40  ;;  %v1596_v22 = vmax.f32 %v1594_v1, %v1595_v36  ;;  %v1744_v40 = vrot.slane %v853_v9, 2  ;;  %v1604_v57 = vmax.f32 %v1602_v35, %v1603_v41 }
 0x2a3   :  { %v1854_v15 = vadd.f32 %v3260_v31, %v1781_v33  ;;  %v857_v37 = vpop.f32.mrb[48].mxu1  ;;  %v3387_v11 = vpop.f32.mrb[64].mxu0  ;;  %v3403_v9 = vrot.slane %v3348_v53, %v1936_v30  ;;  %v3406_v35 = vrot.slane %v3366_v47, %v1936_v30  ;;  %v1634_v41 = vadd.f32 %v3356_v43, %v1580_v14 }
 0x2a4   :  { %v1870_v63 = vsel %vm1813_vm4, %v1855_v55, -inf  ;;  %v1673_v45 = vrot.slane %v857_v37, 1  ;;  %v3833_v59 = vrot.slane %v3387_v11, 3  ;;  %v859_v54 = vpop.f32.mrb[49].mxu1  ;;  %v3391_v16 = vpop.f32.mrb[65].mxu0  ;;  %v3864_v30 = vrot.slane %v3265_v42, 3 }
 0x2a5   :  { %3862 = vst [vmem:[#allocation19_spill] sm:$0xff] %v3391_v16  ;;  %v1871_v29 = vmax.f32 %v1854_v15, %v1870_v63  ;;  %v1745_v8 = vrot.slane %v859_v54, 2  ;;  %v1636_v63 = vadd.f32 %v3356_v43, %v1596_v22 }
 0x2a6   :  { %v1674_v31 = vsel %vm1435_vm3, %v1672_v26, %v1673_v45  ;;  %v1712_v10 = vadd.f32 %v1673_v45, %v3213_v56  ;;  %v3398_v55 = vsel %vm1813_vm4, %v1832_v50, %v3833_v59  ;;  %v3411_v50 = vmul.f32 %v3380_v52, %v1633_v4 }
 0x2a7   :  { %v1872_v37 = vrot.slane %v1871_v29, 4  ;;  %v1711_v17 = vadd.f32 %v1674_v31, %v3208_v46  ;;  %v1746_v0 = vsel %vm1508_vm0, %v1744_v40, %v1745_v8  ;;  %v863_v19 = vpop.f32.mrb[50].mxu1  ;;  %v1084_v1 = vpop.f32.mrb[66].mxu0  ;;  %v1635_v26 = vadd.f32 %v3356_v43, %v1588_v7 }
 0x2a8   :  { %v1784_v36 = vadd.f32 %v1745_v8, %v1712_v10  ;;  %v865_v56 = vpop.f32.mrb[51].mxu1  ;;  %v3408_v33 = vpop.f32.mrb[67].mxu0  ;;  %v1637_v45 = vadd.f32 %v3356_v43, %v1604_v57  ;;  %v1607_v40 = vrot.slane %v3297_v38, 4  ;;  %v1675_v4 = vrot.slane %v863_v19, 1 }
 0x2a9   :  { %3863 = vst [vmem:[#allocation20_spill] sm:$0xff] %v3408_v33  ;;  %v1873_v46 = vmax.f32 %v1871_v29, %v1872_v37  ;;  %v1783_v15 = vadd.f32 %v1746_v0, %v1711_v17  ;;  %v1835_v29 = vrot.slane %v1084_v1, 3  ;;  %v1747_v0 = vrot.slane %v865_v56, 2 }
 0x2aa   :  { %v1857_v54 = vadd.f32 %v3864_v30, %v1784_v36 }
 0x2ab   :  { %v1874_v8 = vrot.slane %v1873_v46, 2  ;;  %v1856_v31 = vadd.f32 %v3273_v51, %v1783_v15  ;;  %v869_v10 = vpop.f32.mrb[52].mxu1  ;;  %v3421_v59 = vpop.f32.mrb[68].mxu0  ;;  %v3428_v51 = vmul.f32 %v3380_v52, %v1634_v41  ;;  %v3440_v41 = vmul.f32 %v3380_v52, %v1635_v26 }
 0x2ac   :  { %v1878_v14 = vsel %vm1813_vm4, %v1857_v54, -inf  ;;  %v1676_v7 = vrot.slane %v869_v10, 1  ;;  %v3834_v22 = vrot.slane %v3421_v59, 3  ;;  %v871_v37 = vpop.f32.mrb[53].mxu1  ;;  %v3425_v57 = vpop.f32.mrb[69].mxu0  ;;  %v3866_v26 = vrot.slane %v3278_v5, 3 }
 0x2ad   :  { %3865 = vst [vmem:[#allocation21_spill] sm:$0xff] %v3425_v57  ;;  %v1875_v42 = vmax.f32 %v1873_v46, %v1874_v8  ;;  %v1879_v17 = vmax.f32 %v1856_v31, %v1878_v14  ;;  %v1748_v36 = vrot.slane %v871_v37, 2 }
 0x2ae   :  { %v1677_v19 = vsel %vm1435_vm3, %v1675_v4, %v1676_v7  ;;  %v1714_v15 = vadd.f32 %v1676_v7, %v3222_v13  ;;  %v3435_v1 = vsel %vm1813_vm4, %v1835_v29, %v3834_v22  ;;  %v3443_v4 = vmul.f32 %v3380_v52, %v1636_v63 }
 0x2af   :  { %v1876_v30 = vrot.slane %v1875_v42, 1  ;;  %v1880_v54 = vrot.slane %v1879_v17, 4  ;;  %v1713_v46 = vadd.f32 %v1677_v19, %v3217_v3  ;;  %v1749_v56 = vsel %vm1508_vm0, %v1747_v0, %v1748_v36  ;;  %v875_v8 = vpop.f32.mrb[54].mxu1  ;;  %v1322_v31 = vpop.f32.mrb[70].mxu0 }
 0x2b0   :  { %v1786_v13 = vadd.f32 %v1748_v36, %v1714_v15  ;;  %v877_v10 = vpop.f32.mrb[55].mxu1  ;;  %v1324_v14 = vpop.f32.mrb[71].mxu0  ;;  %v3446_v29 = vmul.f32 %v3380_v52, %v1637_v45  ;;  %v3449_v7 = vmax.f32 %v3297_v38, %v1607_v40  ;;  %v1615_v19 = vrot.slane %v3321_v21, 4 }
 0x2b1   :  { %v1877_v3 = vmax.f32 %v1875_v42, %v1876_v30  ;;  %v1881_v37 = vmax.f32 %v1879_v17, %v1880_v54  ;;  %v1785_v0 = vadd.f32 %v1749_v56, %v1713_v46  ;;  %v1678_v33 = vrot.slane %v875_v8, 1 }
 0x2b2   :  { %v1859_v22 = vadd.f32 %v3866_v26, %v1786_v13  ;;  %v2126_v63 = vrot.slane %v1322_v31, 3  ;;  %v1750_v45 = vrot.slane %v877_v10, 2  ;;  %v2199_v40 = vrot.slane %v1324_v14, 4 }
 0x2b3   :  { %v1938_v36 = vadd.f32 %v3403_v9, %v1877_v3  ;;  %v1882_v15 = vrot.slane %v1881_v37, 2  ;;  %v1858_v57 = vadd.f32 %v3289_v2, %v1785_v0  ;;  %v881_v16 = vpop.f32.mrb[56].mxu1  ;;  %v3456_v47 = vpop.f32.mrb[72].mxu0 }
 0x2b4   :  { %v1886_v38 = vsel %vm1813_vm4, %v1859_v22, -inf  ;;  %v1679_v42 = vrot.slane %v881_v16, 1  ;;  %v3837_v17 = vrot.slane %v3456_v47, 3  ;;  %v883_v30 = vpop.f32.mrb[57].mxu1  ;;  %v3460_v5 = vpop.f32.mrb[73].mxu0 }
 0x2b5   :  { %v1950_v54 = vmul.f32 %v3406_v35, %v1938_v36  ;;  %v1883_v46 = vmax.f32 %v1881_v37, %v1882_v15  ;;  %v1887_v56 = vmax.f32 %v1858_v57, %v1886_v38  ;;  %v1751_v8 = vrot.slane %v883_v30, 2 }
 0x2b6   :  { %v1680_v2 = vsel %vm1435_vm3, %v1678_v33, %v1679_v42  ;;  %v1716_v31 = vadd.f32 %v1679_v42, %v3231_v34  ;;  %v3468_v22 = vsel %vm1813_vm4, %v2126_v63, %v3837_v17  ;;  %v3836_v16 = vrot.slane %v3460_v5, 4 }
 0x2b7   :  { %v3472_v13 = vadd.f32 %v1950_v54, %v3411_v50  ;;  %v1884_v10 = vrot.slane %v1883_v46, 1  ;;  %v1888_v14 = vrot.slane %v1887_v56, 4  ;;  %v1715_v3 = vadd.f32 %v1680_v2, %v3226_v23  ;;  %v887_v57 = vpop.f32.mrb[58].mxu1  ;;  %v1334_v37 = vpop.f32.mrb[74].mxu0 }
 0x2b8   :  { %v1609_v33 = vrot.slane %v3449_v7, 2  ;;  %v1752_v34 = vsel %vm1508_vm0, %v1750_v45, %v1751_v8  ;;  %v1788_v0 = vadd.f32 %v1751_v8, %v1716_v31  ;;  %v3480_v26 = vsel %vm2198_vm5, %v2199_v40, %v3836_v16  ;;  %v889_v63 = vpop.f32.mrb[59].mxu1  ;;  %v1336_v36 = vpop.f32.mrb[75].mxu0 }
 0x2b9   :  { %3867 = vst [vmem:[#allocation22_spill] sm:$0xff] %v3472_v13  ;;  %v3483_v50 = vmax.f32 %v3321_v21, %v1615_v19  ;;  %v1885_v15 = vmax.f32 %v1883_v46, %v1884_v10  ;;  %v1889_v38 = vmax.f32 %v1887_v56, %v1888_v14  ;;  %v1787_v23 = vadd.f32 %v1752_v34, %v1715_v3 }
 0x2ba   :  { %v1623_v42 = vrot.slane %v3353_v24, 4  ;;  %v3868_v30 = vrot.slane %v3299_v20, 3  ;;  %v1681_v45 = vrot.slane %v887_v57, 1  ;;  %v2129_v8 = vrot.slane %v1334_v37, 3 }
 0x2bb   :  { %v1939_v2 = vadd.f32 %v3403_v9, %v1885_v15  ;;  %v1890_v31 = vrot.slane %v1889_v38, 2  ;;  %v1860_v40 = vadd.f32 %v3311_v61, %v1787_v23  ;;  %v1753_v16 = vrot.slane %v889_v63, 2  ;;  %v893_v17 = vpop.f32.mrb[60].mxu1  ;;  %v3490_v13 = vpop.f32.mrb[76].mxu0 }
 0x2bc   :  { %v1861_v54 = vadd.f32 %v3868_v30, %v1788_v0  ;;  %v2202_v19 = vrot.slane %v1336_v36, 4  ;;  %v1682_v46 = vrot.slane %v893_v17, 1  ;;  %v3841_v56 = vrot.slane %v3490_v13, 3  ;;  %v895_v10 = vpop.f32.mrb[61].mxu1  ;;  %v3494_v20 = vpop.f32.mrb[77].mxu0 }
 0x2bd   :  { %v1951_v14 = vmul.f32 %v3406_v35, %v1939_v2  ;;  %v1891_v3 = vmax.f32 %v1889_v38, %v1890_v31  ;;  %v1754_v37 = vrot.slane %v895_v10, 2  ;;  %v3838_v17 = vrot.slane %v3494_v20, 4 }
 0x2be   :  { %v1894_v21 = vsel %vm1813_vm4, %v1861_v54, -inf  ;;  %v1683_v61 = vsel %vm1435_vm3, %v1681_v45, %v1682_v46  ;;  %v1718_v34 = vadd.f32 %v1682_v46, %v3240_v58  ;;  %v3502_v0 = vsel %vm1813_vm4, %v2129_v8, %v3841_v56 }
 0x2bf   :  { %v1895_v57 = vmax.f32 %v1860_v40, %v1894_v21  ;;  %v3506_v63 = vadd.f32 %v1951_v14, %v3428_v51  ;;  %v1892_v36 = vrot.slane %v1891_v3, 1  ;;  %v1717_v38 = vadd.f32 %v1683_v61, %v3235_v44  ;;  %v899_v23 = vpop.f32.mrb[62].mxu1  ;;  %v1346_v30 = vpop.f32.mrb[78].mxu0 }
 0x2c0   :  { %v3510_v54 = vmax.f32 %v3449_v7, %v1609_v33  ;;  %v1755_v58 = vsel %vm1508_vm0, %v1753_v16, %v1754_v37  ;;  %v1790_v45 = vadd.f32 %v1754_v37, %v1718_v34  ;;  %v3516_v8 = vsel %vm2198_vm5, %v2202_v19, %v3838_v17  ;;  %v901_v2 = vpop.f32.mrb[63].mxu1  ;;  %v1348_v51 = vpop.f32.mrb[79].mxu0 }
 0x2c1   :  { %v1896_v15 = vrot.slane %v1895_v57, 4  ;;  %v1617_v31 = vrot.slane %v3483_v50, 2  ;;  %v1893_v40 = vmax.f32 %v1891_v3, %v1892_v36  ;;  %v1789_v44 = vadd.f32 %v1755_v58, %v1717_v38 }
 0x2c2   :  { %v3520_v46 = vmax.f32 %v3353_v24, %v1623_v42  ;;  %v3869_v7 = vrot.slane %v3329_v39, 3  ;;  %v1684_v16 = vrot.slane %v899_v23, 1  ;;  %v2132_v10 = vrot.slane %v1346_v30, 3 }
 0x2c3   :  { %v1897_v21 = vmax.f32 %v1895_v57, %v1896_v15  ;;  %v1940_v14 = vadd.f32 %v3403_v9, %v1893_v40  ;;  %v1862_v19 = vadd.f32 %v3342_v62, %v1789_v44  ;;  %v1756_v61 = vrot.slane %v901_v2, 2  ;;  %v905_v34 = vpop.f32.mrb[64].mxu1  ;;  %v3526_v17 = vpop.f32.mrb[80].mxu0 }
 0x2c4   :  { %v1863_v33 = vadd.f32 %v3869_v7, %v1790_v45  ;;  %v2205_v57 = vrot.slane %v1348_v51, 4  ;;  %v1685_v36 = vrot.slane %v905_v34, 1  ;;  %v3839_v24 = vrot.slane %v3526_v17, 3  ;;  %v907_v42 = vpop.f32.mrb[65].mxu1  ;;  %v3530_v39 = vpop.f32.mrb[81].mxu0 }
 0x2c5   :  { %v1898_v37 = vrot.slane %v1897_v21, 2  ;;  %v1952_v15 = vmul.f32 %v3406_v35, %v1940_v14  ;;  %v1757_v30 = vrot.slane %v907_v42, 2  ;;  %v3840_v2 = vrot.slane %v3530_v39, 4 }
 0x2c6   :  { %v1902_v3 = vsel %vm1813_vm4, %v1863_v33, -inf  ;;  %v1686_v62 = vsel %vm1435_vm3, %v1684_v16, %v1685_v36  ;;  %v1720_v58 = vadd.f32 %v1685_v36, %v3281_v12  ;;  %v3538_v45 = vsel %vm1813_vm4, %v2132_v10, %v3839_v24 }
 0x2c7   :  { %v1899_v38 = vmax.f32 %v1897_v21, %v1898_v37  ;;  %v1903_v23 = vmax.f32 %v1862_v19, %v1902_v3  ;;  %v1719_v44 = vadd.f32 %v1686_v62, %v3244_v6  ;;  %v1758_v7 = vsel %vm1508_vm0, %v1756_v61, %v1757_v30  ;;  %v911_v21 = vpop.f32.mrb[66].mxu1  ;;  %v1358_v33 = vpop.f32.mrb[82].mxu0 }
 0x2c8   :  { %v1611_v14 = vrot.slane %v3510_v54, 1  ;;  %v3545_v16 = vmax.f32 %v3483_v50, %v1617_v31  ;;  %v1792_v12 = vadd.f32 %v1757_v30, %v1720_v58  ;;  %v3550_v10 = vsel %vm2198_vm5, %v2205_v57, %v3840_v2  ;;  %v913_v37 = vpop.f32.mrb[67].mxu1  ;;  %v1360_v19 = vpop.f32.mrb[83].mxu0 }
 0x2c9   :  { %v1900_v51 = vrot.slane %v1899_v38, 1  ;;  %v1904_v40 = vrot.slane %v1903_v23, 4  ;;  %v1625_v34 = vrot.slane %v3520_v46, 2  ;;  %v1791_v61 = vadd.f32 %v1758_v7, %v1719_v44 }
 0x2ca   :  { %v3870_v36 = vrot.slane %v3358_v60, 3  ;;  %v1687_v62 = vrot.slane %v911_v21, 1  ;;  %v2135_v24 = vrot.slane %v1358_v33, 3  ;;  %v3556_v50 = vadd.f32 %v1952_v15, %v3440_v41 }
 0x2cb   :  { %v1901_v6 = vmax.f32 %v1899_v38, %v1900_v51  ;;  %v1905_v3 = vmax.f32 %v1903_v23, %v1904_v40  ;;  %v1864_v57 = vadd.f32 %v3373_v48, %v1791_v61  ;;  %v1759_v58 = vrot.slane %v913_v37, 2  ;;  %v917_v2 = vpop.f32.mrb[68].mxu1  ;;  %v3560_v56 = vpop.f32.mrb[84].mxu0 }
 0x2cc   :  { %v1865_v42 = vadd.f32 %v3870_v36, %v1792_v12  ;;  %v2208_v23 = vrot.slane %v1360_v19, 4  ;;  %v1688_v51 = vrot.slane %v917_v2, 1  ;;  %v3843_v60 = vrot.slane %v3560_v56, 3  ;;  %v919_v40 = vpop.f32.mrb[69].mxu1  ;;  %v3564_v44 = vpop.f32.mrb[85].mxu0 }
 0x2cd   :  { %v1941_v31 = vadd.f32 %v3403_v9, %v1901_v6  ;;  %v1906_v30 = vrot.slane %v1905_v3, 2  ;;  %v1760_v21 = vrot.slane %v919_v40, 2  ;;  %v3842_v2 = vrot.slane %v3564_v44, 4 }
 0x2ce   :  { %v1910_v38 = vsel %vm1813_vm4, %v1865_v42, -inf  ;;  %v1689_v48 = vsel %vm1435_vm3, %v1687_v62, %v1688_v51  ;;  %v1722_v33 = vadd.f32 %v1688_v51, %v3302_v49  ;;  %v3572_v12 = vsel %vm1813_vm4, %v2135_v24, %v3843_v60 }
 0x2cf   :  { %v1953_v41 = vmul.f32 %v3406_v35, %v1941_v31  ;;  %v1907_v15 = vmax.f32 %v1905_v3, %v1906_v30  ;;  %v1911_v7 = vmax.f32 %v1864_v57, %v1910_v38  ;;  %v1721_v6 = vadd.f32 %v1689_v48, %v3292_v32  ;;  %v923_v3 = vpop.f32.mrb[70].mxu1  ;;  %v1370_v36 = vpop.f32.mrb[86].mxu0 }
 0x2d0   :  { %v1761_v61 = vsel %vm1508_vm0, %v1759_v58, %v1760_v21  ;;  %v1612_v42 = vmax.f32 %v3510_v54, %v1611_v14  ;;  %v1619_v62 = vrot.slane %v3545_v16, 1  ;;  %v1794_v49 = vadd.f32 %v1760_v21, %v1722_v33  ;;  %v925_v31 = vpop.f32.mrb[71].mxu1  ;;  %v1372_v30 = vpop.f32.mrb[87].mxu0 }
 0x2d1   :  { %v1908_v37 = vrot.slane %v1907_v15, 1  ;;  %v1912_v19 = vrot.slane %v1911_v7, 4  ;;  %v3582_v24 = vsel %vm2198_vm5, %v2208_v23, %v3842_v2  ;;  %v3585_v57 = vmax.f32 %v3520_v46, %v1625_v34 }
 0x2d2   :  { %v1793_v58 = vadd.f32 %v1761_v61, %v1721_v6  ;;  %v3871_v51 = vrot.slane %v3387_v11, 3  ;;  %v1690_v54 = vrot.slane %v923_v3, 1  ;;  %v2138_v14 = vrot.slane %v1370_v36, 3 }
 0x2d3   :  { %v1909_v32 = vmax.f32 %v1907_v15, %v1908_v37  ;;  %v1913_v38 = vmax.f32 %v1911_v7, %v1912_v19  ;;  %v3590_v21 = vadd.f32 %v1953_v41, %v3443_v4  ;;  %v1762_v2 = vrot.slane %v925_v31, 2  ;;  %v929_v60 = vpop.f32.mrb[72].mxu1  ;;  %v3594_v46 = vpop.f32.mrb[88].mxu0 }
 0x2d4   :  { %v1867_v40 = vadd.f32 %v3871_v51, %v1794_v49  ;;  %v1866_v33 = vadd.f32 %v3398_v55, %v1793_v58  ;;  %v2211_v15 = vrot.slane %v1372_v30, 4  ;;  %v1691_v7 = vrot.slane %v929_v60, 1  ;;  %v931_v37 = vpop.f32.mrb[73].mxu1  ;;  %v3598_v19 = vpop.f32.mrb[89].mxu0 }
 0x2d5   :  { %3872 = vst [vmem:[#allocation23_spill] sm:$0xff] %v3590_v21  ;;  %v1942_v48 = vadd.f32 %v3403_v9, %v1909_v32  ;;  %v1914_v23 = vrot.slane %v1913_v38, 2  ;;  %v3847_v11 = vrot.slane %v3594_v46, 3  ;;  %v1763_v6 = vrot.slane %v931_v37, 2 }
 0x2d6   :  { %v1918_v34 = vsel %vm1813_vm4, %v1867_v40, -inf  ;;  %v3844_v61 = vrot.slane %v3598_v19, 4  ;;  %v1692_v55 = vsel %vm1435_vm3, %v1690_v54, %v1691_v7  ;;  %v1724_v3 = vadd.f32 %v1691_v7, %v3332_v25 }
 0x2d7   :  { %v1915_v4 = vmax.f32 %v1913_v38, %v1914_v23  ;;  %v1919_v41 = vmax.f32 %v1866_v33, %v1918_v34  ;;  %v3606_v36 = vsel %vm1813_vm4, %v2138_v14, %v3847_v11  ;;  %v1954_v60 = vmul.f32 %v3406_v35, %v1942_v48  ;;  %v1161_v38 = vpop.f32.mrb[74].mxu1  ;;  %v1382_v58 = vpop.f32.mrb[90].mxu0 }
 0x2d8   :  { %v1723_v30 = vadd.f32 %v1692_v55, %v3316_v18  ;;  %v1764_v32 = vsel %vm1508_vm0, %v1762_v2, %v1763_v6  ;;  %v1638_v51 = vadd.f32 %v3356_v43, %v1612_v42  ;;  %v1620_v40 = vmax.f32 %v3545_v16, %v1619_v62  ;;  %v1163_v14 = vpop.f32.mrb[75].mxu1  ;;  %v1384_v48 = vpop.f32.mrb[91].mxu0 }
 0x2d9   :  { %v1916_v49 = vrot.slane %v1915_v4, 1  ;;  %v1920_v31 = vrot.slane %v1919_v41, 4  ;;  %v1796_v25 = vadd.f32 %v1763_v6, %v1724_v3  ;;  %v3616_v54 = vsel %vm2198_vm5, %v2211_v15, %v3844_v61 }
 0x2da   :  { %v1627_v23 = vrot.slane %v3585_v57, 1  ;;  %v1795_v34 = vadd.f32 %v1764_v32, %v1723_v30  ;;  %v3873_v2 = vrot.slane %v3421_v59, 3  ;;  %v1982_v37 = vrot.slane %v1161_v38, 1 }
 0x2db   :  { %v1917_v33 = vmax.f32 %v1915_v4, %v1916_v49  ;;  %v1921_v18 = vmax.f32 %v1919_v41, %v1920_v31  ;;  %v2141_v42 = vrot.slane %v1382_v58, 3  ;;  %v3622_v16 = vadd.f32 %v1954_v60, %v3446_v29  ;;  %v1167_v3 = vpop.f32.mrb[76].mxu1  ;;  %v3626_v61 = vpop.f32.mrb[92].mxu0 }
 0x2dc   :  { %v1869_v7 = vadd.f32 %v3873_v2, %v1796_v25  ;;  %v1868_v15 = vadd.f32 %v3435_v1, %v1795_v34  ;;  %v2054_v55 = vrot.slane %v1163_v14, 2  ;;  %v2214_v41 = vrot.slane %v1384_v48, 4  ;;  %v1169_v31 = vpop.f32.mrb[77].mxu1  ;;  %v3630_v30 = vpop.f32.mrb[93].mxu0  ;;  %v3875_v34 = vld [vmem:[#allocation6_spill] sm:$0xff] }
 0x2dd   :  { %3874 = vst [vmem:[#allocation24_spill] sm:$0xff] %v3622_v16  ;;  %v1943_v62 = vadd.f32 %v3403_v9, %v1917_v33  ;;  %v1922_v6 = vrot.slane %v1921_v18, 2  ;;  %v1983_v49 = vrot.slane %v1167_v3, 1  ;;  %v3845_v59 = vrot.slane %v3626_v61, 3 }
 0x2de   :  { %v1926_v4 = vsel %vm1813_vm4, %v1869_v7, -inf  ;;  %v2055_v32 = vrot.slane %v1169_v31, 2  ;;  %v3846_v38 = vrot.slane %v3630_v30, 4 }
 0x2df   :  { %v1923_v29 = vmax.f32 %v1921_v18, %v1922_v6  ;;  %v1927_v60 = vmax.f32 %v1868_v15, %v1926_v4  ;;  %v1984_v1 = vsel %vm1435_vm3, %v1982_v37, %v1983_v49  ;;  %v2023_v58 = vadd.f32 %v1983_v49, %v3255_v28  ;;  %v1173_v7 = vpop.f32.mrb[78].mxu1  ;;  %v1394_v6 = vpop.f32.mrb[94].mxu0 }
 0x2e0   :  { %v3638_v25 = vsel %vm1813_vm4, %v2141_v42, %v3845_v59  ;;  %v1955_v14 = vmul.f32 %v3406_v35, %v1943_v62  ;;  %v2022_v2 = vadd.f32 %v1984_v1, %v3875_v34  ;;  %v2056_v18 = vsel %vm1508_vm0, %v2054_v55, %v2055_v32  ;;  %v1175_v42 = vpop.f32.mrb[79].mxu1  ;;  %v1396_v3 = vpop.f32.mrb[95].mxu0 }
 0x2e1   :  { %v1924_v48 = vrot.slane %v1923_v29, 1  ;;  %v1928_v33 = vrot.slane %v1927_v60, 4  ;;  %v1639_v15 = vadd.f32 %v3356_v43, %v1620_v40  ;;  %v2095_v37 = vadd.f32 %v2055_v32, %v2023_v58 }
 0x2e2   :  { %v3647_v28 = vsel %vm2198_vm5, %v2214_v41, %v3846_v38  ;;  %v1650_v62 = vmul.f32 %v3380_v52, %v1638_v51  ;;  %v1628_v4 = vmax.f32 %v3585_v57, %v1627_v23  ;;  %v2094_v1 = vadd.f32 %v2056_v18, %v2022_v2 }
 0x2e3   :  { %v1925_v49 = vmax.f32 %v1923_v29, %v1924_v48  ;;  %v1929_v31 = vmax.f32 %v1927_v60, %v1928_v33  ;;  %v3876_v55 = vrot.slane %v3456_v47, 3  ;;  %v1985_v59 = vrot.slane %v1173_v7, 1  ;;  %v1179_v16 = vpop.f32.mrb[80].mxu1  ;;  %v3656_v21 = vpop.f32.mrb[96].mxu0 }
 0x2e4   :  { %v2144_v40 = vrot.slane %v1394_v6, 3  ;;  %v3653_v32 = vadd.f32 %v1955_v14, %v1650_v62  ;;  %v2166_v41 = vadd.f32 %v3468_v22, %v2094_v1  ;;  %v2057_v38 = vrot.slane %v1175_v42, 2  ;;  %v1181_v47 = vpop.f32.mrb[81].mxu1  ;;  %v3661_v60 = vpop.f32.mrb[97].mxu0 }
 0x2e5   :  { %v2167_v34 = vadd.f32 %v3876_v55, %v2095_v37  ;;  %v1930_v58 = vrot.slane %v1929_v31, 2  ;;  %v2217_v11 = vrot.slane %v1396_v3, 4  ;;  %v3877_v57 = vrot.slane %v3460_v5, 4  ;;  %v3878_v5 = vld [vmem:[#allocation8_spill] sm:$0xff]  ;;  %v3879_v3 = vld [vmem:[#allocation7_spill] sm:$0xff] }
 0x2e6   :  { %v1986_v23 = vrot.slane %v1179_v16, 1  ;;  %v2145_v29 = vrot.slane %v3656_v21, 3  ;;  %v1944_v14 = vadd.f32 %v3403_v9, %v1925_v49  ;;  %v2239_v33 = vadd.f32 %v3480_v26, %v2166_v41 }
 0x2e7   :  { %v2240_v51 = vadd.f32 %v3877_v57, %v2167_v34  ;;  %v1931_v48 = vmax.f32 %v1929_v31, %v1930_v58  ;;  %v2058_v22 = vrot.slane %v1181_v47, 2  ;;  %v2218_v2 = vrot.slane %v3661_v60, 4  ;;  %v1185_v49 = vpop.f32.mrb[82].mxu1  ;;  %v1406_v31 = vpop.f32.mrb[98].mxu0 }
 0x2e8   :  { %v1987_v7 = vsel %vm1435_vm3, %v1985_v59, %v1986_v23  ;;  %v2025_v6 = vadd.f32 %v1986_v23, %v3878_v5  ;;  %v3672_v16 = vsel %vm1813_vm4, %v2144_v40, %v2145_v29  ;;  %v2321_v1 = vsub.s32 2, %v3325_v27  ;;  %v1187_v34 = vpop.f32.mrb[83].mxu1  ;;  %v1408_v58 = vpop.f32.mrb[99].mxu0 }
 0x2e9   :  { %v2255_v18 = vsel %vm2198_vm5, %v2240_v51, -inf  ;;  %v1932_v37 = vrot.slane %v1931_v48, 1  ;;  %v2024_v62 = vadd.f32 %v1987_v7, %v3879_v3  ;;  %v2059_v26 = vsel %vm1508_vm0, %v2057_v38, %v2058_v22 }
 0x2ea   :  { %v2256_v42 = vmax.f32 %v2239_v33, %v2255_v18  ;;  %v2097_v55 = vadd.f32 %v2058_v22, %v2025_v6  ;;  %v3680_v59 = vsel %vm2198_vm5, %v2217_v11, %v2218_v2  ;;  %v1651_v40 = vmul.f32 %v3380_v52, %v1639_v15 }
 0x2eb   :  { %v2096_v57 = vadd.f32 %v2059_v26, %v2024_v62  ;;  %v1988_v51 = vrot.slane %v1185_v49, 1  ;;  %v1640_v23 = vadd.f32 %v3356_v43, %v1628_v4  ;;  %v3880_v38 = vrot.slane %v3490_v13, 3  ;;  %v1191_v5 = vpop.f32.mrb[84].mxu1  ;;  %v3687_v6 = vpop.f32.mrb[100].mxu0 }
 0x2ec   :  { %v2257_v41 = vrot.slane %v2256_v42, 4  ;;  %v2147_v33 = vrot.slane %v1406_v31, 3  ;;  %v2060_v27 = vrot.slane %v1187_v34, 2  ;;  %v1933_v22 = vmax.f32 %v1931_v48, %v1932_v37  ;;  %v1193_v13 = vpop.f32.mrb[85].mxu1  ;;  %v3693_v4 = vpop.f32.mrb[101].mxu0 }
 0x2ed   :  { %v2169_v47 = vadd.f32 %v3880_v38, %v2097_v55  ;;  %v2168_v7 = vadd.f32 %v3502_v0, %v2096_v57  ;;  %v2220_v11 = vrot.slane %v1408_v58, 4  ;;  %v1956_v15 = vmul.f32 %v3406_v35, %v1944_v14 }
 0x2ee   :  { %v2258_v18 = vmax.f32 %v2256_v42, %v2257_v41  ;;  %v3881_v3 = vrot.slane %v3494_v20, 4  ;;  %v1989_v26 = vrot.slane %v1191_v5, 1  ;;  %v2148_v43 = vrot.slane %v3687_v6, 3  ;;  %v3882_v20 = vld [vmem:[#allocation10_spill] sm:$0xff] }
 0x2ef   :  { %v1945_v48 = vadd.f32 %v3403_v9, %v1933_v22  ;;  %v2241_v0 = vadd.f32 %v3516_v8, %v2168_v7  ;;  %v2061_v42 = vrot.slane %v1193_v13, 2  ;;  %v2221_v49 = vrot.slane %v3693_v4, 4  ;;  %v3883_v9 = vld [vmem:[#allocation9_spill] sm:$0xff]  ;;  %v1197_v38 = vpop.f32.mrb[86].mxu1 }
 0x2f0   :  { %v2242_v62 = vadd.f32 %v3881_v3, %v2169_v47  ;;  %v2259_v37 = vrot.slane %v2258_v18, 2  ;;  %v1990_v14 = vsel %vm1435_vm3, %v1988_v51, %v1989_v26  ;;  %v2027_v55 = vadd.f32 %v1989_v26, %v3882_v20  ;;  %v1199_v51 = vpop.f32.mrb[87].mxu1 }
 0x2f1   :  { %v3704_v34 = vsel %vm1813_vm4, %v2147_v33, %v2148_v43  ;;  %v2026_v57 = vadd.f32 %v1990_v14, %v3883_v9  ;;  %v2062_v8 = vsel %vm1508_vm0, %v2060_v27, %v2061_v42  ;;  %v3711_v22 = vsel %vm2198_vm5, %v2220_v11, %v2221_v49  ;;  %v3887_v9 = vld [vmem:[#allocation12_spill] sm:$0xff] }
 0x2f2   :  { %v2263_v31 = vsel %vm2198_vm5, %v2242_v62, -inf  ;;  %v2260_v58 = vmax.f32 %v2258_v18, %v2259_v37  ;;  %v2099_v47 = vadd.f32 %v2061_v42, %v2027_v55  ;;  %v1652_v7 = vmul.f32 %v3380_v52, %v1640_v23 }
 0x2f3   :  { %v2264_v41 = vmax.f32 %v2241_v0, %v2263_v31  ;;  %v1957_v5 = vmul.f32 %v3406_v35, %v1945_v48  ;;  %v3716_v18 = vrot.slane %v3348_v53, %v2321_v1  ;;  %v2098_v62 = vadd.f32 %v2062_v8, %v2026_v57  ;;  %v3885_v0 = vld [vmem:[#allocation17_spill] sm:$0xff]  ;;  %v1203_v23 = vpop.f32.mrb[88].mxu1 }
 0x2f4   :  { %v2261_v33 = vrot.slane %v2260_v58, 1  ;;  %v3884_v27 = vrot.slane %v3526_v17, 3  ;;  %v3720_v13 = vadd.f32 %v1956_v15, %v1651_v40  ;;  %v3725_v42 = vrot.slane %v3885_v0, %v2321_v1  ;;  %v1205_v20 = vpop.f32.mrb[89].mxu1 }
 0x2f5   :  { %v2265_v3 = vrot.slane %v2264_v41, 4  ;;  %v3722_v37 = vadd.f32 %v1957_v5, %v1652_v7  ;;  %v2170_v35 = vadd.f32 %v3538_v45, %v2098_v62  ;;  %v3886_v53 = vrot.slane %v3530_v39, 4 }
 0x2f6   :  { %v2171_v26 = vadd.f32 %v3884_v27, %v2099_v47  ;;  %v2262_v11 = vmax.f32 %v2260_v58, %v2261_v33  ;;  %v1991_v31 = vrot.slane %v1197_v38, 1  ;;  %v1992_v14 = vrot.slane %v1203_v23, 1  ;;  %v3888_v38 = vld [vmem:[#allocation11_spill] sm:$0xff] }
 0x2f7   :  { %v2266_v52 = vmax.f32 %v2264_v41, %v2265_v3  ;;  %v2243_v15 = vadd.f32 %v3550_v10, %v2170_v35  ;;  %v2064_v55 = vrot.slane %v1205_v20, 2  ;;  %v2063_v1 = vrot.slane %v1199_v51, 2  ;;  %v1209_v7 = vpop.f32.mrb[90].mxu1 }
 0x2f8   :  { %v2244_v48 = vadd.f32 %v3886_v53, %v2171_v26  ;;  %v2323_v17 = vadd.f32 %v3716_v18, %v2262_v11  ;;  %v1993_v41 = vsel %vm1435_vm3, %v1991_v31, %v1992_v14  ;;  %v2029_v45 = vadd.f32 %v1992_v14, %v3887_v9  ;;  %v1211_v3 = vpop.f32.mrb[91].mxu1  ;;  %v3890_v11 = vld [vmem:[#allocation22_spill] sm:$0xff] }
 0x2f9   :  { %v2267_v40 = vrot.slane %v2266_v52, 2  ;;  %v2028_v47 = vadd.f32 %v1993_v41, %v3888_v38  ;;  %v2065_v5 = vsel %vm1508_vm0, %v2063_v1, %v2064_v55  ;;  %v3889_v51 = vrot.slane %v3560_v56, 3  ;;  %v3892_v9 = vld [vmem:[#allocation14_spill] sm:$0xff] }
 0x2fa   :  { %v2271_v58 = vsel %vm2198_vm5, %v2244_v48, -inf  ;;  %v2335_v57 = vmul.f32 %v3725_v42, %v2323_v17  ;;  %v2101_v33 = vadd.f32 %v2064_v55, %v2029_v45  ;;  %v3891_v48 = vrot.slane %v3564_v44, 4 }
 0x2fb   :  { %v2268_v39 = vmax.f32 %v2266_v52, %v2267_v40  ;;  %v2272_v8 = vmax.f32 %v2243_v15, %v2271_v58  ;;  %v2100_v27 = vadd.f32 %v2065_v5, %v2028_v47  ;;  %v1215_v53 = vpop.f32.mrb[92].mxu1  ;;  %v1994_v14 = vrot.slane %v1209_v7, 1 }
 0x2fc   :  { %v2173_v26 = vadd.f32 %v3889_v51, %v2101_v33  ;;  %v2343_v0 = vadd.f32 %v2335_v57, %v3890_v11  ;;  %v1995_v20 = vrot.slane %v1215_v53, 1  ;;  %v1217_v17 = vpop.f32.mrb[93].mxu1  ;;  %v2066_v1 = vrot.slane %v1211_v3, 2 }
 0x2fd   :  { %v2269_v10 = vrot.slane %v2268_v39, 1  ;;  %v2273_v62 = vrot.slane %v2272_v8, 4  ;;  %v2172_v52 = vadd.f32 %v3572_v12, %v2100_v27  ;;  %v2067_v56 = vrot.slane %v1217_v17, 2 }
 0x2fe   :  { %v2246_v31 = vadd.f32 %v3891_v48, %v2173_v26  ;;  %v1996_v41 = vsel %vm1435_vm3, %v1994_v14, %v1995_v20  ;;  %v2031_v12 = vadd.f32 %v1995_v20, %v3892_v9  ;;  %v3894_v3 = vrot.slane %v3594_v46, 3 }
 0x2ff   :  { %v2270_v35 = vmax.f32 %v2268_v39, %v2269_v10  ;;  %v2274_v23 = vmax.f32 %v2272_v8, %v2273_v62  ;;  %v2245_v55 = vadd.f32 %v3582_v24, %v2172_v52  ;;  %v3893_v39 = vld [vmem:[#allocation13_spill] sm:$0xff]  ;;  %v1221_v38 = vpop.f32.mrb[94].mxu1  ;;  %v2068_v47 = vsel %vm1508_vm0, %v2066_v1, %v2067_v56 }
 0x300   :  { %v2279_v58 = vsel %vm2198_vm5, %v2246_v31, -inf  ;;  %v2030_v8 = vadd.f32 %v1996_v41, %v3893_v39  ;;  %v2103_v7 = vadd.f32 %v2067_v56, %v2031_v12  ;;  %v1223_v5 = vpop.f32.mrb[95].mxu1  ;;  %v3895_v52 = vrot.slane %v3598_v19, 4  ;;  %v3897_v41 = vld [vmem:[#allocation15_spill] sm:$0xff] }
 0x301   :  { %v2324_v40 = vadd.f32 %v3716_v18, %v2270_v35  ;;  %v2275_v15 = vrot.slane %v2274_v23, 2  ;;  %v2280_v57 = vmax.f32 %v2245_v55, %v2279_v58  ;;  %v1997_v35 = vrot.slane %v1221_v38, 1 }
 0x302   :  { %v2102_v10 = vadd.f32 %v2068_v47, %v2030_v8  ;;  %v2175_v62 = vadd.f32 %v3894_v3, %v2103_v7  ;;  %v2069_v48 = vrot.slane %v1223_v5, 2  ;;  %v3898_v47 = vrot.slane %v3626_v61, 3 }
 0x303   :  { %v2336_v45 = vmul.f32 %v3725_v42, %v2324_v40  ;;  %v2276_v44 = vmax.f32 %v2274_v23, %v2275_v15  ;;  %v2281_v33 = vrot.slane %v2280_v57, 4  ;;  %v1227_v23 = vpop.f32.mrb[96].mxu1 }
 0x304   :  { %v2174_v11 = vadd.f32 %v3606_v36, %v2102_v10  ;;  %v2248_v53 = vadd.f32 %v3895_v52, %v2175_v62  ;;  %v1998_v31 = vrot.slane %v1227_v23, 1  ;;  %v1229_v14 = vpop.f32.mrb[97].mxu1  ;;  %v3896_v36 = vld [vmem:[#allocation16_spill] sm:$0xff]  ;;  %v3899_v62 = vrot.slane %v3630_v30, 4 }
 0x305   :  { %v2277_v24 = vrot.slane %v2276_v44, 1  ;;  %v2344_v27 = vadd.f32 %v2336_v45, %v3506_v63  ;;  %v2282_v26 = vmax.f32 %v2280_v57, %v2281_v33  ;;  %v2070_v63 = vrot.slane %v1229_v14, 2 }
 0x306   :  { %v2247_v40 = vadd.f32 %v3616_v54, %v2174_v11  ;;  %v2287_v15 = vsel %vm2198_vm5, %v2248_v53, -inf  ;;  %v1999_v55 = vsel %vm1435_vm3, %v1997_v35, %v1998_v31  ;;  %v2033_v56 = vadd.f32 %v1998_v31, %v3896_v36 }
 0x307   :  { %v2278_v51 = vmax.f32 %v2276_v44, %v2277_v24  ;;  %v2359_v20 = vrot.slane %v2344_v27, 7  ;;  %v2283_v46 = vrot.slane %v2282_v26, 2  ;;  %v2032_v9 = vadd.f32 %v1999_v55, %v3897_v41  ;;  %v1233_v45 = vpop.f32.mrb[98].mxu1  ;;  %v3902_v41 = vld [vmem:[#allocation23_spill] sm:$0xff] }
 0x308   :  { %v2288_v1 = vmax.f32 %v2247_v40, %v2287_v15  ;;  %v2071_v12 = vsel %vm1508_vm0, %v2069_v48, %v2070_v63  ;;  %v2105_v44 = vadd.f32 %v2070_v63, %v2033_v56  ;;  %v1235_v57 = vpop.f32.mrb[99].mxu1  ;;  %v2000_v10 = vrot.slane %v1233_v45, 1 }
 0x309   :  { %v2325_v17 = vadd.f32 %v3716_v18, %v2278_v51  ;;  %v2361_v58 = vsel %vm2360_vm6, %v2359_v20, %v2343_v0  ;;  %v2284_v19 = vmax.f32 %v2282_v26, %v2283_v46  ;;  %v2104_v38 = vadd.f32 %v2071_v12, %v2032_v9 }
 0x30a   :  { %v2289_v8 = vrot.slane %v2288_v1, 4  ;;  %v2177_v7 = vadd.f32 %v3898_v47, %v2105_v44  ;;  %v2072_v51 = vrot.slane %v1235_v57, 2 }
 0x30b   :  { %v2337_v54 = vmul.f32 %v3725_v42, %v2325_v17  ;;  %v2285_v39 = vrot.slane %v2284_v19, 1  ;;  %v2176_v33 = vadd.f32 %v3638_v25, %v2104_v38  ;;  %v1239_v3 = vpop.f32.mrb[100].mxu1  ;;  %v3900_v25 = vld [vmem:[#allocation19_spill] sm:$0xff]  ;;  %v3901_v17 = vld [vmem:[#allocation18_spill] sm:$0xff] }
 0x30c   :  { %v2290_v24 = vmax.f32 %v2288_v1, %v2289_v8  ;;  %v2250_v27 = vadd.f32 %v3899_v62, %v2177_v7  ;;  %v2001_v26 = vrot.slane %v1239_v3, 1  ;;  %v1241_v11 = vpop.f32.mrb[101].mxu1  ;;  %v3904_v3 = vld [vmem:[#allocation20_spill] sm:$0xff] }
 0x30d   :  { %v2345_v5 = vadd.f32 %v2337_v54, %v3556_v50  ;;  %v2286_v0 = vmax.f32 %v2284_v19, %v2285_v39  ;;  %v2249_v52 = vadd.f32 %v3647_v28, %v2176_v33  ;;  %v2073_v50 = vrot.slane %v1241_v11, 2 }
 0x30e   :  { %v2291_v61 = vrot.slane %v2290_v24, 2  ;;  %v2295_v53 = vsel %vm2198_vm5, %v2250_v27, -inf  ;;  %v2002_v48 = vsel %vm1435_vm3, %v2000_v10, %v2001_v26  ;;  %v2035_v31 = vadd.f32 %v2001_v26, %v3900_v25 }
 0x30f   :  { %v2362_v35 = vrot.slane %v2345_v5, 6  ;;  %v2326_v23 = vadd.f32 %v3716_v18, %v2286_v0  ;;  %v2296_v20 = vmax.f32 %v2249_v52, %v2295_v53  ;;  %v2034_v46 = vadd.f32 %v2002_v48, %v3901_v17  ;;  %v1245_v63 = vpop.f32.mrb[102].mxu1 }
 0x310   :  { %v2292_v30 = vmax.f32 %v2290_v24, %v2291_v61  ;;  %v2074_v40 = vsel %vm1508_vm0, %v2072_v51, %v2073_v50  ;;  %v2107_v15 = vadd.f32 %v2073_v50, %v2035_v31  ;;  %v1247_v55 = vpop.f32.mrb[103].mxu1  ;;  %v2003_v44 = vrot.slane %v1245_v63, 1  ;;  %v3905_v61 = vld [vmem:[#allocation24_spill] sm:$0xff] }
 0x311   :  { %v2364_v14 = vsel %vm2363_vm7, %v2362_v35, %v2361_v58  ;;  %v2338_v28 = vmul.f32 %v3725_v42, %v2326_v23  ;;  %v2297_v56 = vrot.slane %v2296_v20, 4  ;;  %v2106_v19 = vadd.f32 %v2074_v40, %v2034_v46 }
 0x312   :  { %v2293_v36 = vrot.slane %v2292_v30, 1  ;;  %v2179_v1 = vadd.f32 %v2145_v29, %v2107_v15  ;;  %v2075_v39 = vrot.slane %v1247_v55, 2 }
 0x313   :  { %v2346_v9 = vadd.f32 %v2338_v28, %v3902_v41  ;;  %v2298_v12 = vmax.f32 %v2296_v20, %v2297_v56  ;;  %v2178_v45 = vadd.f32 %v3672_v16, %v2106_v19  ;;  %v1251_v57 = vpop.f32.mrb[104].mxu1  ;;  %v3903_v16 = vld [vmem:[#allocation21_spill] sm:$0xff] }
 0x314   :  { %v2294_v58 = vmax.f32 %v2292_v30, %v2293_v36  ;;  %v2252_v54 = vadd.f32 %v2218_v2, %v2179_v1  ;;  %v2004_v8 = vrot.slane %v1251_v57, 1  ;;  %v1253_v38 = vpop.f32.mrb[105].mxu1 }
 0x315   :  { %v2365_v47 = vrot.slane %v2346_v9, 5  ;;  %v2299_v7 = vrot.slane %v2298_v12, 2  ;;  %v2251_v21 = vadd.f32 %v3680_v59, %v2178_v45  ;;  %v2076_v29 = vrot.slane %v1253_v38, 2 }
 0x316   :  { %v2327_v5 = vadd.f32 %v3716_v18, %v2294_v58  ;;  %v2303_v0 = vsel %vm2198_vm5, %v2252_v54, -inf  ;;  %v2005_v24 = vsel %vm1435_vm3, %v2003_v44, %v2004_v8  ;;  %v2037_v33 = vadd.f32 %v2004_v8, %v3903_v16 }
 0x317   :  { %v2367_v10 = vsel %vm2366_vm8, %v2365_v47, %v2364_v14  ;;  %v2300_v60 = vmax.f32 %v2298_v12, %v2299_v7  ;;  %v2304_v2 = vmax.f32 %v2251_v21, %v2303_v0  ;;  %v2036_v62 = vadd.f32 %v2005_v24, %v3904_v3 }
 0x318   :  { %v2077_v27 = vsel %vm1508_vm0, %v2075_v39, %v2076_v29  ;;  %v2109_v51 = vadd.f32 %v2076_v29, %v2037_v33  ;;  %v2339_v59 = vmul.f32 %v3725_v42, %v2327_v5  ;;  %v2384_v39 = vstv %s3825_s5 }
 0x319   :  { %v2301_v26 = vrot.slane %v2300_v60, 1  ;;  %v2305_v11 = vrot.slane %v2304_v2, 4  ;;  %v2108_v35 = vadd.f32 %v2077_v27, %v2036_v62 }
 0x31a   :  { %v2181_v23 = vadd.f32 %v2148_v43, %v2109_v51  ;;  %v2347_v52 = vadd.f32 %v2339_v59, %v3905_v61 }
 0x31b   :  { %v2302_v50 = vmax.f32 %v2300_v60, %v2301_v26  ;;  %v2306_v53 = vmax.f32 %v2304_v2, %v2305_v11  ;;  %v2180_v48 = vadd.f32 %v3704_v34, %v2108_v35 }
 0x31c   :  { %v2254_v25 = vadd.f32 %v2221_v49, %v2181_v23  ;;  %v2368_v31 = vrot.slane %v2347_v52, 4 }
 0x31d   :  { %v2307_v14 = vrot.slane %v2306_v53, 2  ;;  %v2253_v30 = vadd.f32 %v3711_v22, %v2180_v48  ;;  %v2328_v20 = vadd.f32 %v3716_v18, %v2302_v50 }
 0x31e   :  { %v2311_v17 = vsel %vm2198_vm5, %v2254_v25, -inf  ;;  %v2370_v6 = vsel %vm2369_vm9, %v2368_v31, %v2367_v10 }
 0x31f   :  { %v2308_v43 = vmax.f32 %v2306_v53, %v2307_v14  ;;  %v2312_v46 = vmax.f32 %v2253_v30, %v2311_v17  ;;  %v2340_v40 = vmul.f32 %v3725_v42, %v2328_v20 }
 0x321   :  { %v2309_v63 = vrot.slane %v2308_v43, 1  ;;  %v2313_v15 = vrot.slane %v2312_v46, 4  ;;  %v2348_v34 = vadd.f32 %v2340_v40, %v3653_v32 }
 0x323   :  { %v2314_v4 = vmax.f32 %v2312_v46, %v2313_v15  ;;  %v2310_v49 = vmax.f32 %v2308_v43, %v2309_v63  ;;  %v2371_v55 = vrot.slane %v2348_v34, 3 }
 0x325   :  { %v2315_v28 = vrot.slane %v2314_v4, 2  ;;  %v2329_v22 = vadd.f32 %v3716_v18, %v2310_v49  ;;  %v2373_v36 = vsel %vm2372_vm10, %v2371_v55, %v2370_v6 }
 0x327   :  { %v2316_v56 = vmax.f32 %v2314_v4, %v2315_v28  ;;  %v2341_v19 = vmul.f32 %v3725_v42, %v2329_v22 }
 0x329   :  { %v2317_v1 = vrot.slane %v2316_v56, 1  ;;  %v2349_v41 = vadd.f32 %v2341_v19, %v3720_v13 }
 0x32b   :  { %v2318_v9 = vmax.f32 %v2316_v56, %v2317_v1  ;;  %v2374_v58 = vrot.slane %v2349_v41, 2 }
 0x32d   :  { %v2330_v12 = vadd.f32 %v3716_v18, %v2318_v9  ;;  %v2376_v32 = vsel %vm2375_vm11, %v2374_v58, %v2373_v36 }
 0x32f   :  { %v2342_v45 = vmul.f32 %v3725_v42, %v2330_v12 }
 0x331   :  { %v2350_v44 = vadd.f32 %v2342_v45, %v3722_v37 }
 0x333   :  { %v2377_v57 = vrot.slane %v2350_v44, 1 }
 0x335   :  { %v2379_v54 = vsel %vm2378_vm12, %v2377_v57, %v2376_v32 }
 0x336   :  { %2381 = vadd.xlane.f32.xlu0 %v2379_v54 }
 0x3c3   :  { %v2382_v8 = vpop.xlane.xlu0 %2381 }
 0x3c4   :  { %v2385_v13 = vadd.f32 %v2384_v39, %v2382_v8 }
 0x3c6   :  { %v2527_v38 = vmul.f32 -1.442695, %v2385_v13 }
 0x3c8   :  { %2667 = vpow2.f32 %v2527_v38 }
 0x3d2   :  { %v2668_v47 = vpop.eup %2667 }
 0x3d3   :  { %v2389_v7 = vadd.f32 1.0, %v2668_v47 }
 0x3d5   :  { %2669 = vrcp.f32 %v2389_v7 }
 0x3df   :  { %v2670_v18 = vpop.eup %2669 }
 0x3e0   :  { %2393 = vst.msk [vmem:[%s3826_s6] sm:$0xff] %vm2392_vm13, %v2670_v18 }
 0x3e1   :  { %2398 = vsyncpa [#allocation4], 1 }

</bundles_post_ra>
